<compile_context>
chip_gen: v5e
topology: v5e:2x2
jax: 0.10.0
libtpu: 0.0.40
codegen_flags: <defaults>
</compile_context>

<pallas_src>
import math

import jax
import jax.numpy as jnp
from jax.experimental import pallas as pl
from jax.experimental.pallas import tpu as pltpu

# ---------------- small deterministic BERT config ----------------
VOCAB = 128
HIDDEN = 32
N_LAYERS = 2
N_HEADS = 4
HEAD_DIM = HIDDEN // N_HEADS
INTER = 64
MAX_POS = 32
LN_EPS = 1e-12
VEC_W = max(3 * HIDDEN, INTER)          # 96: packed per-layer vector width
OUT_PAD = 128                           # lane-dense pooler output width


def _ln(x, g, b):
    mu = jnp.mean(x, axis=-1, keepdims=True)
    var = jnp.mean((x - mu) ** 2, axis=-1, keepdims=True)
    return (x - mu) * jax.lax.rsqrt(var + LN_EPS) * g + b


# ---------------- the fused kernel (one chunk of the batch, all layers) ----------------
def fused_bert_kernel(x_ref, bias_ref, wqkv_ref, wo_ref, w1_ref, w2_ref,
                      vecs_ref, poolw_ref, gvec_ref, out_ref):
    BC, S, H = x_ref.shape
    NH, D = N_HEADS, HEAD_DIM
    M = BC * S

    # ---- embeddings LayerNorm (token/pos/type gather+sum done in wrapper)
    eg = gvec_ref[1:2, :H]
    eb = gvec_ref[2:3, :H]
    x = _ln(x_ref[...].reshape(M, H), eg, eb)                      # [M, H] f32

    # ---- additive attention-mask bias: broadcast ONCE, reused by every layer
    bias = jnp.broadcast_to(bias_ref[...][:, None, :, :],
                            (BC, NH, 1, S)).reshape(BC * NH, 1, S)  # f32

    scale = 1.0 / math.sqrt(D)

    # ---- static layer loop: every weight ref is fully VMEM-resident
    for l in range(N_LAYERS):
        vec = vecs_ref[l]                                          # [8, VEC_W] f32
        b_qkv = vec[0:1, :3 * H]
        b_o = vec[1:2, :H]
        g1 = vec[2:3, :H]
        be1 = vec[3:4, :H]
        b_f1 = vec[4:5, :INTER]
        b_f2 = vec[5:6, :H]
        g2 = vec[6:7, :H]
        be2 = vec[7:8, :H]

        xb = x.astype(jnp.bfloat16)

        # fused QKV projection: one [M,H] @ [H,3H] MXU matmul
        qkv = jnp.dot(xb, wqkv_ref[l],
                      preferred_element_type=jnp.float32) + b_qkv   # [M, 3H] f32

        # single reshape + single transpose to head-major, then ONE bf16 cast
        qkv_h = (qkv.reshape(BC, S, 3 * NH, D)
                 .transpose(0, 2, 1, 3)                              # [BC, 3NH, S, D]
                 .astype(jnp.bfloat16))
        q = qkv_h[:, 0 * NH:1 * NH].reshape(BC * NH, S, D)
        k = qkv_h[:, 1 * NH:2 * NH].reshape(BC * NH, S, D)
        v = qkv_h[:, 2 * NH:3 * NH].reshape(BC * NH, S, D)

        s = jnp.einsum('hqd,hkd->hqk', q, k,
                       preferred_element_type=jnp.float32)           # [BC*NH, S, S]
        s = s * scale + bias
        s = s - jnp.max(s, axis=-1, keepdims=True)
        p = jnp.exp(s)
        p = p * pl.reciprocal(jnp.sum(p, axis=-1, keepdims=True), approx=True)

        ctx = jnp.einsum('hqk,hkd->hqd', p.astype(jnp.bfloat16), v,
                         preferred_element_type=jnp.float32)          # [BC*NH, S, D]
        # re-concatenate heads -> ONE [M,H]@[H,H] output projection (no head-sum)
        ctx = (ctx.reshape(BC, NH, S, D)
               .transpose(0, 2, 1, 3)
               .reshape(M, H)
               .astype(jnp.bfloat16))
        attn = jnp.dot(ctx, wo_ref[l],
                       preferred_element_type=jnp.float32) + b_o

        x1 = _ln(x + attn, g1, be1)                                   # [M, H] f32

        # feed-forward
        h1 = jnp.dot(x1.astype(jnp.bfloat16), w1_ref[l],
                     preferred_element_type=jnp.float32) + b_f1
        # TODO(synk): HF BERT default is exact (erf) GELU; tanh approximation used.
        h1 = jax.nn.gelu(h1, approximate=True)
        ffn = jnp.dot(h1.astype(jnp.bfloat16), w2_ref[l],
                      preferred_element_type=jnp.float32) + b_f2

        x = _ln(x1 + ffn, g2, be2)

    # ---- pooler (Linear + tanh) on [CLS]; single lane-dense (128-wide) store
    cls = x.reshape(BC, S, H)[:, 0, :]                                # [BC, H]
    pooled = jnp.tanh(jnp.dot(cls.astype(jnp.bfloat16), poolw_ref[...],
                              preferred_element_type=jnp.float32)
                      + gvec_ref[0:1, :])                             # [BC, OUT_PAD]
    out_ref[...] = pooled.reshape(BC, 1, OUT_PAD)


# ---------------- parameter init (deterministic, synthetic) ----------------
def init_params(key):
    def normal(k, shape, std=0.02):
        return std * jax.random.normal(k, shape, dtype=jnp.float32)

    keys = iter(jax.random.split(key, 4 + N_LAYERS * 6))
    p = {
        'word_emb': normal(next(keys), (VOCAB, HIDDEN)),
        'pos_emb': normal(next(keys), (MAX_POS, HIDDEN)),
        'type_emb': normal(next(keys), (2, HIDDEN)),
        'emb_ln_g': jnp.ones((1, HIDDEN), jnp.float32),
        'emb_ln_b': jnp.zeros((1, HIDDEN), jnp.float32),
        'pool_w': normal(next(keys), (HIDDEN, HIDDEN)),
        'pool_b': jnp.zeros((1, HIDDEN), jnp.float32),
        'layers': [],
    }
    for _ in range(N_LAYERS):
        p['layers'].append({
            'wq': normal(next(keys), (HIDDEN, HIDDEN)),
            'bq': jnp.zeros((1, HIDDEN), jnp.float32),
            'wk': normal(next(keys), (HIDDEN, HIDDEN)),
            'bk': jnp.zeros((1, HIDDEN), jnp.float32),
            'wv': normal(next(keys), (HIDDEN, HIDDEN)),
            'bv': jnp.zeros((1, HIDDEN), jnp.float32),
            'wo': normal(next(keys), (HIDDEN, HIDDEN)),
            'bo': jnp.zeros((1, HIDDEN), jnp.float32),
            'ln1_g': jnp.ones((1, HIDDEN), jnp.float32),
            'ln1_b': jnp.zeros((1, HIDDEN), jnp.float32),
            'w1': normal(next(keys), (HIDDEN, INTER)),
            'b1': jnp.zeros((1, INTER), jnp.float32),
            'w2': normal(next(keys), (INTER, HIDDEN)),
            'b2': jnp.zeros((1, HIDDEN), jnp.float32),
            'ln2_g': jnp.ones((1, HIDDEN), jnp.float32),
            'ln2_b': jnp.zeros((1, HIDDEN), jnp.float32),
        })
    return p


def pack_params(p):
    """Stack per-layer weights [L, ...] (bf16 matmul weights) + pack small vectors."""
    def pad_row(v, width=VEC_W):
        v = v.reshape(1, -1)
        return jnp.pad(v, ((0, 0), (0, width - v.shape[1])))

    wqkv = jnp.stack([jnp.concatenate([lp['wq'], lp['wk'], lp['wv']], axis=1)
                      for lp in p['layers']]).astype(jnp.bfloat16)       # [L, H, 3H]
    wo = jnp.stack([lp['wo'] for lp in p['layers']]).astype(jnp.bfloat16)  # [L, H, H]
    w1 = jnp.stack([lp['w1'] for lp in p['layers']]).astype(jnp.bfloat16)  # [L, H, I]
    w2 = jnp.stack([lp['w2'] for lp in p['layers']]).astype(jnp.bfloat16)  # [L, I, H]

    vecs = jnp.stack([jnp.concatenate([
        pad_row(jnp.concatenate([lp['bq'], lp['bk'], lp['bv']], axis=1)),
        pad_row(lp['bo']), pad_row(lp['ln1_g']), pad_row(lp['ln1_b']),
        pad_row(lp['b1']), pad_row(lp['b2']),
        pad_row(lp['ln2_g']), pad_row(lp['ln2_b']),
    ], axis=0) for lp in p['layers']])                                   # [L, 8, 96]

    # pooler weight padded to a lane-dense 128-wide output; gvec rows:
    #   0 = pool_b (padded), 1 = emb_ln_g, 2 = emb_ln_b, rest zero.
    pool_w = jnp.pad(p['pool_w'], ((0, 0), (0, OUT_PAD - HIDDEN))).astype(jnp.bfloat16)
    gvec = jnp.concatenate([
        pad_row(p['pool_b'], OUT_PAD),
        pad_row(p['emb_ln_g'], OUT_PAD),
        pad_row(p['emb_ln_b'], OUT_PAD),
        jnp.zeros((5, OUT_PAD), jnp.float32),
    ], axis=0)                                                           # [8, 128]

    return {'wqkv': wqkv, 'wo': wo, 'w1': w1, 'w2': w2, 'vecs': vecs,
            'pool_w': pool_w, 'gvec': gvec}


# ---------------- forward: single fused pallas_call ----------------
def text_encoder_forward(params, packed, input_ids, attention_mask):
    B, S = input_ids.shape
    H = HIDDEN
    # 2-way batch split keeps both v7x TensorCores busy; on v6e/v5e it is just
    # 2 serial grid steps (vs B*L before).
    n_chunks = 2 if (B % 2 == 0 and B >= 2) else 1
    bc = B // n_chunks

    # Tiny embedding gathers + sum stay in XLA; the LayerNorm is fused into the kernel.
    # token_type_ids are all zero.
    we = params['word_emb'][input_ids]                 # [B, S, H]
    pe = params['pos_emb'][:S][None]                   # [1, S, H]
    te = params['type_emb'][0][None, None]             # [1, 1, H]
    x_emb = (we + pe + te).astype(jnp.float32)

    # additive attention-mask bias, precomputed once in the wrapper (hoisted)
    bias = ((1.0 - attention_mask.astype(jnp.float32)) * -10000.0)[:, None, :]  # [B,1,S]

    out = pl.pallas_call(
        fused_bert_kernel,
        out_shape=jax.ShapeDtypeStruct((B, 1, OUT_PAD), jnp.float32),
        grid_spec=pltpu.PrefetchScalarGridSpec(
            num_scalar_prefetch=0,
            grid=(n_chunks,),
            in_specs=[
                pl.BlockSpec((bc, S, H), lambda c: (c, 0, 0)),               # x_emb
                pl.BlockSpec((bc, 1, S), lambda c: (c, 0, 0)),               # mask bias
                pl.BlockSpec((N_LAYERS, H, 3 * H), lambda c: (0, 0, 0)),     # wqkv (all L)
                pl.BlockSpec((N_LAYERS, H, H), lambda c: (0, 0, 0)),         # wo   (all L)
                pl.BlockSpec((N_LAYERS, H, INTER), lambda c: (0, 0, 0)),     # w1   (all L)
                pl.BlockSpec((N_LAYERS, INTER, H), lambda c: (0, 0, 0)),     # w2   (all L)
                pl.BlockSpec((N_LAYERS, 8, VEC_W), lambda c: (0, 0, 0)),     # vecs (all L)
                pl.BlockSpec((H, OUT_PAD), lambda c: (0, 0)),                # pool_w
                pl.BlockSpec((8, OUT_PAD), lambda c: (0, 0)),                # gvec
            ],
            out_specs=pl.BlockSpec((bc, 1, OUT_PAD), lambda c: (c, 0, 0)),
        ),
        compiler_params=pltpu.CompilerParams(
            dimension_semantics=("parallel",)),
    )(x_emb, bias, packed['wqkv'], packed['wo'], packed['w1'], packed['w2'],
      packed['vecs'], packed['pool_w'], packed['gvec'])

    # nn.Dropout(0.1): identity at inference time.  Strip lane padding.
    return out[:, 0, :H]


if __name__ == "__main__":
    key = jax.random.PRNGKey(0)
    pkey, ikey = jax.random.split(key)
    params = init_params(pkey)
    packed = pack_params(params)

    B, S = 2, 8
    input_ids = jax.random.randint(ikey, (B, S), 0, VOCAB, dtype=jnp.int32)
    attention_mask = jnp.array([[1, 1, 1, 1, 1, 1, 0, 0],
                                [1, 1, 1, 1, 1, 1, 1, 1]], dtype=jnp.int32)

    out = text_encoder_forward(params, packed, input_ids, attention_mask)
    out = jax.block_until_ready(out)
    assert out.shape == (B, HIDDEN) and out.dtype == jnp.float32
    assert bool(jnp.all(jnp.isfinite(out)))
    print("KERNEL_OK")
</pallas_src>

<mosaic_0001>
module attributes {stable_mosaic.version = 11 : i64} {
  func.func @fused_bert_kernel(%arg0: i32, %arg1: memref<1x8x32xf32, #tpu.memory_space<vmem>>, %arg2: memref<1x1x8xf32, #tpu.memory_space<vmem>>, %arg3: memref<2x32x96xbf16, #tpu.memory_space<vmem>>, %arg4: memref<2x32x32xbf16, #tpu.memory_space<vmem>>, %arg5: memref<2x32x64xbf16, #tpu.memory_space<vmem>>, %arg6: memref<2x64x32xbf16, #tpu.memory_space<vmem>>, %arg7: memref<2x8x96xf32, #tpu.memory_space<vmem>>, %arg8: memref<32x128xbf16, #tpu.memory_space<vmem>>, %arg9: memref<8x128xf32, #tpu.memory_space<vmem>>, %arg10: memref<1x1x128xf32, #tpu.memory_space<vmem>>) attributes {dimension_semantics = [#tpu.dimension_semantics<parallel>], iteration_bounds = array<i64: 2>, scalar_prefetch = 0 : i64, scratch_operands = 0 : i64, tpu.core_type = #tpu.core_type<tc>, window_params = [{transform_indices = @transform_0, window_bounds = array<i64: 1, 8, 32>}, {transform_indices = @transform_1, window_bounds = array<i64: 1, 1, 8>}, {pipeline_mode = #tpu.pipeline_mode<synchronous>, transform_indices = @transform_2, window_bounds = array<i64: 2, 32, 96>}, {pipeline_mode = #tpu.pipeline_mode<synchronous>, transform_indices = @transform_3, window_bounds = array<i64: 2, 32, 32>}, {pipeline_mode = #tpu.pipeline_mode<synchronous>, transform_indices = @transform_4, window_bounds = array<i64: 2, 32, 64>}, {pipeline_mode = #tpu.pipeline_mode<synchronous>, transform_indices = @transform_5, window_bounds = array<i64: 2, 64, 32>}, {pipeline_mode = #tpu.pipeline_mode<synchronous>, transform_indices = @transform_6, window_bounds = array<i64: 2, 8, 96>}, {pipeline_mode = #tpu.pipeline_mode<synchronous>, transform_indices = @transform_7, window_bounds = array<i64: 32, 128>}, {pipeline_mode = #tpu.pipeline_mode<synchronous>, transform_indices = @transform_8, window_bounds = array<i64: 8, 128>}, {transform_indices = @transform_9, window_bounds = array<i64: 1, 1, 128>}]} {
    %c1 = arith.constant 1 : index
    %c0 = arith.constant 0 : index
    %0 = vector.load %arg9[%c1, %c0] : memref<8x128xf32, #tpu.memory_space<vmem>>, vector<1x32xf32>
    %c2 = arith.constant 2 : index
    %c0_0 = arith.constant 0 : index
    %1 = vector.load %arg9[%c2, %c0_0] : memref<8x128xf32, #tpu.memory_space<vmem>>, vector<1x32xf32>
    %c0_1 = arith.constant 0 : index
    %c0_2 = arith.constant 0 : index
    %c0_3 = arith.constant 0 : index
    %2 = vector.load %arg1[%c0_1, %c0_2, %c0_3] : memref<1x8x32xf32, #tpu.memory_space<vmem>>, vector<1x8x32xf32>
    %3 = vector.shape_cast %2 : vector<1x8x32xf32> to vector<8x32xf32>
    %cst = arith.constant dense<0.000000e+00> : vector<8xf32>
    %4 = vector.multi_reduction <add>, %3, %cst [1] : vector<8x32xf32> to vector<8xf32>
    %5 = vector.shape_cast %4 : vector<8xf32> to vector<8x1xf32>
    %cst_4 = arith.constant 3.200000e+01 : f32
    %6 = vector.broadcast %cst_4 : f32 to vector<8x1xf32>
    %7 = arith.divf %5, %6 : vector<8x1xf32>
    %8 = vector.broadcast %7 : vector<8x1xf32> to vector<8x32xf32>
    %9 = arith.subf %3, %8 : vector<8x32xf32>
    %10 = arith.mulf %9, %9 : vector<8x32xf32>
    %cst_5 = arith.constant dense<0.000000e+00> : vector<8xf32>
    %11 = vector.multi_reduction <add>, %10, %cst_5 [1] : vector<8x32xf32> to vector<8xf32>
    %12 = vector.shape_cast %11 : vector<8xf32> to vector<8x1xf32>
    %cst_6 = arith.constant 3.200000e+01 : f32
    %13 = vector.broadcast %cst_6 : f32 to vector<8x1xf32>
    %14 = arith.divf %12, %13 : vector<8x1xf32>
    %15 = vector.broadcast %7 : vector<8x1xf32> to vector<8x32xf32>
    %16 = arith.subf %3, %15 : vector<8x32xf32>
    %cst_7 = arith.constant 9.99999996E-13 : f32
    %17 = vector.broadcast %cst_7 : f32 to vector<8x1xf32>
    %18 = arith.addf %14, %17 : vector<8x1xf32>
    %19 = math.rsqrt %18 : vector<8x1xf32>
    %20 = vector.broadcast %19 : vector<8x1xf32> to vector<8x32xf32>
    %21 = arith.mulf %16, %20 : vector<8x32xf32>
    %22 = vector.broadcast %0 : vector<1x32xf32> to vector<8x32xf32>
    %23 = arith.mulf %21, %22 : vector<8x32xf32>
    %24 = vector.broadcast %1 : vector<1x32xf32> to vector<8x32xf32>
    %25 = arith.addf %23, %24 : vector<8x32xf32>
    %c0_8 = arith.constant 0 : index
    %c0_9 = arith.constant 0 : index
    %c0_10 = arith.constant 0 : index
    %26 = vector.load %arg2[%c0_8, %c0_9, %c0_10] : memref<1x1x8xf32, #tpu.memory_space<vmem>>, vector<1x1x8xf32>
    %27 = vector.shape_cast %26 : vector<1x1x8xf32> to vector<1x1x1x8xf32>
    %28 = vector.shape_cast %27 : vector<1x1x1x8xf32> to vector<1x1x1x8xf32>
    %29 = vector.broadcast %28 : vector<1x1x1x8xf32> to vector<1x4x1x8xf32>
    %30 = vector.shape_cast %29 : vector<1x4x1x8xf32> to vector<4x1x8xf32>
    %c0_11 = arith.constant 0 : index
    %c0_12 = arith.constant 0 : index
    %c0_13 = arith.constant 0 : index
    %31 = vector.load %arg7[%c0_11, %c0_12, %c0_13] : memref<2x8x96xf32, #tpu.memory_space<vmem>>, vector<1x8x96xf32>
    %32 = vector.shape_cast %31 : vector<1x8x96xf32> to vector<8x96xf32>
    %33 = vector.extract_strided_slice %32 {offsets = [0, 0], sizes = [1, 96], strides = [1, 1]} : vector<8x96xf32> to vector<1x96xf32>
    %34 = vector.extract_strided_slice %32 {offsets = [1, 0], sizes = [1, 32], strides = [1, 1]} : vector<8x96xf32> to vector<1x32xf32>
    %35 = vector.extract_strided_slice %32 {offsets = [2, 0], sizes = [1, 32], strides = [1, 1]} : vector<8x96xf32> to vector<1x32xf32>
    %36 = vector.extract_strided_slice %32 {offsets = [3, 0], sizes = [1, 32], strides = [1, 1]} : vector<8x96xf32> to vector<1x32xf32>
    %37 = vector.extract_strided_slice %32 {offsets = [4, 0], sizes = [1, 64], strides = [1, 1]} : vector<8x96xf32> to vector<1x64xf32>
    %38 = vector.extract_strided_slice %32 {offsets = [5, 0], sizes = [1, 32], strides = [1, 1]} : vector<8x96xf32> to vector<1x32xf32>
    %39 = vector.extract_strided_slice %32 {offsets = [6, 0], sizes = [1, 32], strides = [1, 1]} : vector<8x96xf32> to vector<1x32xf32>
    %40 = vector.extract_strided_slice %32 {offsets = [7, 0], sizes = [1, 32], strides = [1, 1]} : vector<8x96xf32> to vector<1x32xf32>
    %41 = arith.truncf %25 : vector<8x32xf32> to vector<8x32xbf16>
    %c0_14 = arith.constant 0 : index
    %c0_15 = arith.constant 0 : index
    %c0_16 = arith.constant 0 : index
    %42 = vector.load %arg3[%c0_14, %c0_15, %c0_16] : memref<2x32x96xbf16, #tpu.memory_space<vmem>>, vector<1x32x96xbf16>
    %43 = vector.shape_cast %42 : vector<1x32x96xbf16> to vector<32x96xbf16>
    %cst_17 = arith.constant dense<0.000000e+00> : vector<8x96xf32>
    %44 = tpu.matmul %41, %43, %cst_17 {dimension_numbers = #tpu.dot_dimension_numbers<[1], [0], [0], [1], [0, 0, 1, 1], [], []>} : vector<8x32xbf16>, vector<32x96xbf16>, vector<8x96xf32> -> vector<8x96xf32>
    %45 = vector.broadcast %33 : vector<1x96xf32> to vector<8x96xf32>
    %46 = arith.addf %44, %45 : vector<8x96xf32>
    %47 = vector.shape_cast %46 : vector<8x96xf32> to vector<1x8x12x8xf32>
    %48 = tpu.transpose %47, [0, 2, 1, 3] : vector<1x8x12x8xf32> -> vector<1x12x8x8xf32>
    %49 = arith.truncf %48 : vector<1x12x8x8xf32> to vector<1x12x8x8xbf16>
    %50 = vector.extract_strided_slice %49 {offsets = [0, 0, 0, 0], sizes = [1, 4, 8, 8], strides = [1, 1, 1, 1]} : vector<1x12x8x8xbf16> to vector<1x4x8x8xbf16>
    %51 = vector.shape_cast %50 : vector<1x4x8x8xbf16> to vector<4x8x8xbf16>
    %52 = vector.extract_strided_slice %49 {offsets = [0, 4, 0, 0], sizes = [1, 4, 8, 8], strides = [1, 1, 1, 1]} : vector<1x12x8x8xbf16> to vector<1x4x8x8xbf16>
    %53 = vector.shape_cast %52 : vector<1x4x8x8xbf16> to vector<4x8x8xbf16>
    %54 = vector.extract_strided_slice %49 {offsets = [0, 8, 0, 0], sizes = [1, 4, 8, 8], strides = [1, 1, 1, 1]} : vector<1x12x8x8xbf16> to vector<1x4x8x8xbf16>
    %55 = vector.shape_cast %54 : vector<1x4x8x8xbf16> to vector<4x8x8xbf16>
    "tpu.trace_start"() <{level = 10 : i32, message = "hqd,hkd->hqk"}> : () -> ()
    %cst_18 = arith.constant dense<0.000000e+00> : vector<4x8x8xf32>
    %56 = tpu.matmul %51, %53, %cst_18 {dimension_numbers = #tpu.dot_dimension_numbers<[2], [2], [1], [1], [0, 0, 0, 1, 1, 1], [0], [0]>} : vector<4x8x8xbf16>, vector<4x8x8xbf16>, vector<4x8x8xf32> -> vector<4x8x8xf32>
    "tpu.trace_stop"() : () -> ()
    %cst_19 = arith.constant 0.353553385 : f32
    %57 = vector.broadcast %cst_19 : f32 to vector<4x8x8xf32>
    %58 = arith.mulf %56, %57 : vector<4x8x8xf32>
    %59 = vector.broadcast %30 : vector<4x1x8xf32> to vector<4x8x8xf32>
    %60 = arith.addf %58, %59 : vector<4x8x8xf32>
    %cst_20 = arith.constant dense<0xFF800000> : vector<4x8xf32>
    %61 = vector.multi_reduction <maximumf>, %60, %cst_20 [2] : vector<4x8x8xf32> to vector<4x8xf32>
    %62 = vector.shape_cast %61 : vector<4x8xf32> to vector<4x8x1xf32>
    %63 = vector.broadcast %62 : vector<4x8x1xf32> to vector<4x8x8xf32>
    %64 = arith.subf %60, %63 : vector<4x8x8xf32>
    %65 = math.exp %64 : vector<4x8x8xf32>
    %cst_21 = arith.constant dense<0.000000e+00> : vector<4x8xf32>
    %66 = vector.multi_reduction <add>, %65, %cst_21 [2] : vector<4x8x8xf32> to vector<4x8xf32>
    %67 = vector.shape_cast %66 : vector<4x8xf32> to vector<4x8x1xf32>
    %68 = tpu.reciprocal %67 {approx = true} : vector<4x8x1xf32> -> vector<4x8x1xf32>
    %69 = vector.broadcast %68 : vector<4x8x1xf32> to vector<4x8x8xf32>
    %70 = arith.mulf %65, %69 : vector<4x8x8xf32>
    %71 = arith.truncf %70 : vector<4x8x8xf32> to vector<4x8x8xbf16>
    "tpu.trace_start"() <{level = 10 : i32, message = "hqk,hkd->hqd"}> : () -> ()
    %cst_22 = arith.constant dense<0.000000e+00> : vector<4x8x8xf32>
    %72 = tpu.matmul %71, %55, %cst_22 {dimension_numbers = #tpu.dot_dimension_numbers<[2], [1], [1], [2], [0, 0, 0, 1, 1, 2], [0], [0]>} : vector<4x8x8xbf16>, vector<4x8x8xbf16>, vector<4x8x8xf32> -> vector<4x8x8xf32>
    "tpu.trace_stop"() : () -> ()
    %73 = vector.shape_cast %72 : vector<4x8x8xf32> to vector<1x4x8x8xf32>
    %74 = tpu.transpose %73, [0, 2, 1, 3] : vector<1x4x8x8xf32> -> vector<1x8x4x8xf32>
    %75 = vector.shape_cast %74 : vector<1x8x4x8xf32> to vector<8x32xf32>
    %76 = arith.truncf %75 : vector<8x32xf32> to vector<8x32xbf16>
    %c0_23 = arith.constant 0 : index
    %c0_24 = arith.constant 0 : index
    %c0_25 = arith.constant 0 : index
    %77 = vector.load %arg4[%c0_23, %c0_24, %c0_25] : memref<2x32x32xbf16, #tpu.memory_space<vmem>>, vector<1x32x32xbf16>
    %78 = vector.shape_cast %77 : vector<1x32x32xbf16> to vector<32x32xbf16>
    %cst_26 = arith.constant dense<0.000000e+00> : vector<8x32xf32>
    %79 = tpu.matmul %76, %78, %cst_26 {dimension_numbers = #tpu.dot_dimension_numbers<[1], [0], [0], [1], [0, 0, 1, 1], [], []>} : vector<8x32xbf16>, vector<32x32xbf16>, vector<8x32xf32> -> vector<8x32xf32>
    %80 = vector.broadcast %34 : vector<1x32xf32> to vector<8x32xf32>
    %81 = arith.addf %79, %80 : vector<8x32xf32>
    %82 = arith.addf %25, %81 : vector<8x32xf32>
    %cst_27 = arith.constant dense<0.000000e+00> : vector<8xf32>
    %83 = vector.multi_reduction <add>, %82, %cst_27 [1] : vector<8x32xf32> to vector<8xf32>
    %84 = vector.shape_cast %83 : vector<8xf32> to vector<8x1xf32>
    %cst_28 = arith.constant 3.200000e+01 : f32
    %85 = vector.broadcast %cst_28 : f32 to vector<8x1xf32>
    %86 = arith.divf %84, %85 : vector<8x1xf32>
    %87 = vector.broadcast %86 : vector<8x1xf32> to vector<8x32xf32>
    %88 = arith.subf %82, %87 : vector<8x32xf32>
    %89 = arith.mulf %88, %88 : vector<8x32xf32>
    %cst_29 = arith.constant dense<0.000000e+00> : vector<8xf32>
    %90 = vector.multi_reduction <add>, %89, %cst_29 [1] : vector<8x32xf32> to vector<8xf32>
    %91 = vector.shape_cast %90 : vector<8xf32> to vector<8x1xf32>
    %cst_30 = arith.constant 3.200000e+01 : f32
    %92 = vector.broadcast %cst_30 : f32 to vector<8x1xf32>
    %93 = arith.divf %91, %92 : vector<8x1xf32>
    %94 = vector.broadcast %86 : vector<8x1xf32> to vector<8x32xf32>
    %95 = arith.subf %82, %94 : vector<8x32xf32>
    %cst_31 = arith.constant 9.99999996E-13 : f32
    %96 = vector.broadcast %cst_31 : f32 to vector<8x1xf32>
    %97 = arith.addf %93, %96 : vector<8x1xf32>
    %98 = math.rsqrt %97 : vector<8x1xf32>
    %99 = vector.broadcast %98 : vector<8x1xf32> to vector<8x32xf32>
    %100 = arith.mulf %95, %99 : vector<8x32xf32>
    %101 = vector.broadcast %35 : vector<1x32xf32> to vector<8x32xf32>
    %102 = arith.mulf %100, %101 : vector<8x32xf32>
    %103 = vector.broadcast %36 : vector<1x32xf32> to vector<8x32xf32>
    %104 = arith.addf %102, %103 : vector<8x32xf32>
    %105 = arith.truncf %104 : vector<8x32xf32> to vector<8x32xbf16>
    %c0_32 = arith.constant 0 : index
    %c0_33 = arith.constant 0 : index
    %c0_34 = arith.constant 0 : index
    %106 = vector.load %arg5[%c0_32, %c0_33, %c0_34] : memref<2x32x64xbf16, #tpu.memory_space<vmem>>, vector<1x32x64xbf16>
    %107 = vector.shape_cast %106 : vector<1x32x64xbf16> to vector<32x64xbf16>
    %cst_35 = arith.constant dense<0.000000e+00> : vector<8x64xf32>
    %108 = tpu.matmul %105, %107, %cst_35 {dimension_numbers = #tpu.dot_dimension_numbers<[1], [0], [0], [1], [0, 0, 1, 1], [], []>} : vector<8x32xbf16>, vector<32x64xbf16>, vector<8x64xf32> -> vector<8x64xf32>
    %109 = vector.broadcast %37 : vector<1x64xf32> to vector<8x64xf32>
    %110 = arith.addf %108, %109 : vector<8x64xf32>
    %111 = arith.mulf %110, %110 : vector<8x64xf32>
    %112 = arith.mulf %110, %111 : vector<8x64xf32>
    %cst_36 = arith.constant 4.471500e-02 : f32
    %113 = vector.broadcast %cst_36 : f32 to vector<8x64xf32>
    %114 = arith.mulf %113, %112 : vector<8x64xf32>
    %115 = arith.addf %110, %114 : vector<8x64xf32>
    %cst_37 = arith.constant 0.797884583 : f32
    %116 = vector.broadcast %cst_37 : f32 to vector<8x64xf32>
    %117 = arith.mulf %116, %115 : vector<8x64xf32>
    %118 = math.tanh %117 : vector<8x64xf32>
    %cst_38 = arith.constant 1.000000e+00 : f32
    %119 = vector.broadcast %cst_38 : f32 to vector<8x64xf32>
    %120 = arith.addf %119, %118 : vector<8x64xf32>
    %cst_39 = arith.constant 5.000000e-01 : f32
    %121 = vector.broadcast %cst_39 : f32 to vector<8x64xf32>
    %122 = arith.mulf %121, %120 : vector<8x64xf32>
    %123 = arith.mulf %110, %122 : vector<8x64xf32>
    %124 = arith.truncf %123 : vector<8x64xf32> to vector<8x64xbf16>
    %c0_40 = arith.constant 0 : index
    %c0_41 = arith.constant 0 : index
    %c0_42 = arith.constant 0 : index
    %125 = vector.load %arg6[%c0_40, %c0_41, %c0_42] : memref<2x64x32xbf16, #tpu.memory_space<vmem>>, vector<1x64x32xbf16>
    %126 = vector.shape_cast %125 : vector<1x64x32xbf16> to vector<64x32xbf16>
    %cst_43 = arith.constant dense<0.000000e+00> : vector<8x32xf32>
    %127 = tpu.matmul %124, %126, %cst_43 {dimension_numbers = #tpu.dot_dimension_numbers<[1], [0], [0], [1], [0, 0, 1, 1], [], []>} : vector<8x64xbf16>, vector<64x32xbf16>, vector<8x32xf32> -> vector<8x32xf32>
    %128 = vector.broadcast %38 : vector<1x32xf32> to vector<8x32xf32>
    %129 = arith.addf %127, %128 : vector<8x32xf32>
    %130 = arith.addf %104, %129 : vector<8x32xf32>
    %cst_44 = arith.constant dense<0.000000e+00> : vector<8xf32>
    %131 = vector.multi_reduction <add>, %130, %cst_44 [1] : vector<8x32xf32> to vector<8xf32>
    %132 = vector.shape_cast %131 : vector<8xf32> to vector<8x1xf32>
    %cst_45 = arith.constant 3.200000e+01 : f32
    %133 = vector.broadcast %cst_45 : f32 to vector<8x1xf32>
    %134 = arith.divf %132, %133 : vector<8x1xf32>
    %135 = vector.broadcast %134 : vector<8x1xf32> to vector<8x32xf32>
    %136 = arith.subf %130, %135 : vector<8x32xf32>
    %137 = arith.mulf %136, %136 : vector<8x32xf32>
    %cst_46 = arith.constant dense<0.000000e+00> : vector<8xf32>
    %138 = vector.multi_reduction <add>, %137, %cst_46 [1] : vector<8x32xf32> to vector<8xf32>
    %139 = vector.shape_cast %138 : vector<8xf32> to vector<8x1xf32>
    %cst_47 = arith.constant 3.200000e+01 : f32
    %140 = vector.broadcast %cst_47 : f32 to vector<8x1xf32>
    %141 = arith.divf %139, %140 : vector<8x1xf32>
    %142 = vector.broadcast %134 : vector<8x1xf32> to vector<8x32xf32>
    %143 = arith.subf %130, %142 : vector<8x32xf32>
    %cst_48 = arith.constant 9.99999996E-13 : f32
    %144 = vector.broadcast %cst_48 : f32 to vector<8x1xf32>
    %145 = arith.addf %141, %144 : vector<8x1xf32>
    %146 = math.rsqrt %145 : vector<8x1xf32>
    %147 = vector.broadcast %146 : vector<8x1xf32> to vector<8x32xf32>
    %148 = arith.mulf %143, %147 : vector<8x32xf32>
    %149 = vector.broadcast %39 : vector<1x32xf32> to vector<8x32xf32>
    %150 = arith.mulf %148, %149 : vector<8x32xf32>
    %151 = vector.broadcast %40 : vector<1x32xf32> to vector<8x32xf32>
    %152 = arith.addf %150, %151 : vector<8x32xf32>
    %c1_49 = arith.constant 1 : index
    %c0_50 = arith.constant 0 : index
    %c0_51 = arith.constant 0 : index
    %153 = vector.load %arg7[%c1_49, %c0_50, %c0_51] : memref<2x8x96xf32, #tpu.memory_space<vmem>>, vector<1x8x96xf32>
    %154 = vector.shape_cast %153 : vector<1x8x96xf32> to vector<8x96xf32>
    %155 = vector.extract_strided_slice %154 {offsets = [0, 0], sizes = [1, 96], strides = [1, 1]} : vector<8x96xf32> to vector<1x96xf32>
    %156 = vector.extract_strided_slice %154 {offsets = [1, 0], sizes = [1, 32], strides = [1, 1]} : vector<8x96xf32> to vector<1x32xf32>
    %157 = vector.extract_strided_slice %154 {offsets = [2, 0], sizes = [1, 32], strides = [1, 1]} : vector<8x96xf32> to vector<1x32xf32>
    %158 = vector.extract_strided_slice %154 {offsets = [3, 0], sizes = [1, 32], strides = [1, 1]} : vector<8x96xf32> to vector<1x32xf32>
    %159 = vector.extract_strided_slice %154 {offsets = [4, 0], sizes = [1, 64], strides = [1, 1]} : vector<8x96xf32> to vector<1x64xf32>
    %160 = vector.extract_strided_slice %154 {offsets = [5, 0], sizes = [1, 32], strides = [1, 1]} : vector<8x96xf32> to vector<1x32xf32>
    %161 = vector.extract_strided_slice %154 {offsets = [6, 0], sizes = [1, 32], strides = [1, 1]} : vector<8x96xf32> to vector<1x32xf32>
    %162 = vector.extract_strided_slice %154 {offsets = [7, 0], sizes = [1, 32], strides = [1, 1]} : vector<8x96xf32> to vector<1x32xf32>
    %163 = arith.truncf %152 : vector<8x32xf32> to vector<8x32xbf16>
    %c1_52 = arith.constant 1 : index
    %c0_53 = arith.constant 0 : index
    %c0_54 = arith.constant 0 : index
    %164 = vector.load %arg3[%c1_52, %c0_53, %c0_54] : memref<2x32x96xbf16, #tpu.memory_space<vmem>>, vector<1x32x96xbf16>
    %165 = vector.shape_cast %164 : vector<1x32x96xbf16> to vector<32x96xbf16>
    %cst_55 = arith.constant dense<0.000000e+00> : vector<8x96xf32>
    %166 = tpu.matmul %163, %165, %cst_55 {dimension_numbers = #tpu.dot_dimension_numbers<[1], [0], [0], [1], [0, 0, 1, 1], [], []>} : vector<8x32xbf16>, vector<32x96xbf16>, vector<8x96xf32> -> vector<8x96xf32>
    %167 = vector.broadcast %155 : vector<1x96xf32> to vector<8x96xf32>
    %168 = arith.addf %166, %167 : vector<8x96xf32>
    %169 = vector.shape_cast %168 : vector<8x96xf32> to vector<1x8x12x8xf32>
    %170 = tpu.transpose %169, [0, 2, 1, 3] : vector<1x8x12x8xf32> -> vector<1x12x8x8xf32>
    %171 = arith.truncf %170 : vector<1x12x8x8xf32> to vector<1x12x8x8xbf16>
    %172 = vector.extract_strided_slice %171 {offsets = [0, 0, 0, 0], sizes = [1, 4, 8, 8], strides = [1, 1, 1, 1]} : vector<1x12x8x8xbf16> to vector<1x4x8x8xbf16>
    %173 = vector.shape_cast %172 : vector<1x4x8x8xbf16> to vector<4x8x8xbf16>
    %174 = vector.extract_strided_slice %171 {offsets = [0, 4, 0, 0], sizes = [1, 4, 8, 8], strides = [1, 1, 1, 1]} : vector<1x12x8x8xbf16> to vector<1x4x8x8xbf16>
    %175 = vector.shape_cast %174 : vector<1x4x8x8xbf16> to vector<4x8x8xbf16>
    %176 = vector.extract_strided_slice %171 {offsets = [0, 8, 0, 0], sizes = [1, 4, 8, 8], strides = [1, 1, 1, 1]} : vector<1x12x8x8xbf16> to vector<1x4x8x8xbf16>
    %177 = vector.shape_cast %176 : vector<1x4x8x8xbf16> to vector<4x8x8xbf16>
    "tpu.trace_start"() <{level = 10 : i32, message = "hqd,hkd->hqk"}> : () -> ()
    %cst_56 = arith.constant dense<0.000000e+00> : vector<4x8x8xf32>
    %178 = tpu.matmul %173, %175, %cst_56 {dimension_numbers = #tpu.dot_dimension_numbers<[2], [2], [1], [1], [0, 0, 0, 1, 1, 1], [0], [0]>} : vector<4x8x8xbf16>, vector<4x8x8xbf16>, vector<4x8x8xf32> -> vector<4x8x8xf32>
    "tpu.trace_stop"() : () -> ()
    %cst_57 = arith.constant 0.353553385 : f32
    %179 = vector.broadcast %cst_57 : f32 to vector<4x8x8xf32>
    %180 = arith.mulf %178, %179 : vector<4x8x8xf32>
    %181 = vector.broadcast %30 : vector<4x1x8xf32> to vector<4x8x8xf32>
    %182 = arith.addf %180, %181 : vector<4x8x8xf32>
    %cst_58 = arith.constant dense<0xFF800000> : vector<4x8xf32>
    %183 = vector.multi_reduction <maximumf>, %182, %cst_58 [2] : vector<4x8x8xf32> to vector<4x8xf32>
    %184 = vector.shape_cast %183 : vector<4x8xf32> to vector<4x8x1xf32>
    %185 = vector.broadcast %184 : vector<4x8x1xf32> to vector<4x8x8xf32>
    %186 = arith.subf %182, %185 : vector<4x8x8xf32>
    %187 = math.exp %186 : vector<4x8x8xf32>
    %cst_59 = arith.constant dense<0.000000e+00> : vector<4x8xf32>
    %188 = vector.multi_reduction <add>, %187, %cst_59 [2] : vector<4x8x8xf32> to vector<4x8xf32>
    %189 = vector.shape_cast %188 : vector<4x8xf32> to vector<4x8x1xf32>
    %190 = tpu.reciprocal %189 {approx = true} : vector<4x8x1xf32> -> vector<4x8x1xf32>
    %191 = vector.broadcast %190 : vector<4x8x1xf32> to vector<4x8x8xf32>
    %192 = arith.mulf %187, %191 : vector<4x8x8xf32>
    %193 = arith.truncf %192 : vector<4x8x8xf32> to vector<4x8x8xbf16>
    "tpu.trace_start"() <{level = 10 : i32, message = "hqk,hkd->hqd"}> : () -> ()
    %cst_60 = arith.constant dense<0.000000e+00> : vector<4x8x8xf32>
    %194 = tpu.matmul %193, %177, %cst_60 {dimension_numbers = #tpu.dot_dimension_numbers<[2], [1], [1], [2], [0, 0, 0, 1, 1, 2], [0], [0]>} : vector<4x8x8xbf16>, vector<4x8x8xbf16>, vector<4x8x8xf32> -> vector<4x8x8xf32>
    "tpu.trace_stop"() : () -> ()
    %195 = vector.shape_cast %194 : vector<4x8x8xf32> to vector<1x4x8x8xf32>
    %196 = tpu.transpose %195, [0, 2, 1, 3] : vector<1x4x8x8xf32> -> vector<1x8x4x8xf32>
    %197 = vector.shape_cast %196 : vector<1x8x4x8xf32> to vector<8x32xf32>
    %198 = arith.truncf %197 : vector<8x32xf32> to vector<8x32xbf16>
    %c1_61 = arith.constant 1 : index
    %c0_62 = arith.constant 0 : index
    %c0_63 = arith.constant 0 : index
    %199 = vector.load %arg4[%c1_61, %c0_62, %c0_63] : memref<2x32x32xbf16, #tpu.memory_space<vmem>>, vector<1x32x32xbf16>
    %200 = vector.shape_cast %199 : vector<1x32x32xbf16> to vector<32x32xbf16>
    %cst_64 = arith.constant dense<0.000000e+00> : vector<8x32xf32>
    %201 = tpu.matmul %198, %200, %cst_64 {dimension_numbers = #tpu.dot_dimension_numbers<[1], [0], [0], [1], [0, 0, 1, 1], [], []>} : vector<8x32xbf16>, vector<32x32xbf16>, vector<8x32xf32> -> vector<8x32xf32>
    %202 = vector.broadcast %156 : vector<1x32xf32> to vector<8x32xf32>
    %203 = arith.addf %201, %202 : vector<8x32xf32>
    %204 = arith.addf %152, %203 : vector<8x32xf32>
    %cst_65 = arith.constant dense<0.000000e+00> : vector<8xf32>
    %205 = vector.multi_reduction <add>, %204, %cst_65 [1] : vector<8x32xf32> to vector<8xf32>
    %206 = vector.shape_cast %205 : vector<8xf32> to vector<8x1xf32>
    %cst_66 = arith.constant 3.200000e+01 : f32
    %207 = vector.broadcast %cst_66 : f32 to vector<8x1xf32>
    %208 = arith.divf %206, %207 : vector<8x1xf32>
    %209 = vector.broadcast %208 : vector<8x1xf32> to vector<8x32xf32>
    %210 = arith.subf %204, %209 : vector<8x32xf32>
    %211 = arith.mulf %210, %210 : vector<8x32xf32>
    %cst_67 = arith.constant dense<0.000000e+00> : vector<8xf32>
    %212 = vector.multi_reduction <add>, %211, %cst_67 [1] : vector<8x32xf32> to vector<8xf32>
    %213 = vector.shape_cast %212 : vector<8xf32> to vector<8x1xf32>
    %cst_68 = arith.constant 3.200000e+01 : f32
    %214 = vector.broadcast %cst_68 : f32 to vector<8x1xf32>
    %215 = arith.divf %213, %214 : vector<8x1xf32>
    %216 = vector.broadcast %208 : vector<8x1xf32> to vector<8x32xf32>
    %217 = arith.subf %204, %216 : vector<8x32xf32>
    %cst_69 = arith.constant 9.99999996E-13 : f32
    %218 = vector.broadcast %cst_69 : f32 to vector<8x1xf32>
    %219 = arith.addf %215, %218 : vector<8x1xf32>
    %220 = math.rsqrt %219 : vector<8x1xf32>
    %221 = vector.broadcast %220 : vector<8x1xf32> to vector<8x32xf32>
    %222 = arith.mulf %217, %221 : vector<8x32xf32>
    %223 = vector.broadcast %157 : vector<1x32xf32> to vector<8x32xf32>
    %224 = arith.mulf %222, %223 : vector<8x32xf32>
    %225 = vector.broadcast %158 : vector<1x32xf32> to vector<8x32xf32>
    %226 = arith.addf %224, %225 : vector<8x32xf32>
    %227 = arith.truncf %226 : vector<8x32xf32> to vector<8x32xbf16>
    %c1_70 = arith.constant 1 : index
    %c0_71 = arith.constant 0 : index
    %c0_72 = arith.constant 0 : index
    %228 = vector.load %arg5[%c1_70, %c0_71, %c0_72] : memref<2x32x64xbf16, #tpu.memory_space<vmem>>, vector<1x32x64xbf16>
    %229 = vector.shape_cast %228 : vector<1x32x64xbf16> to vector<32x64xbf16>
    %cst_73 = arith.constant dense<0.000000e+00> : vector<8x64xf32>
    %230 = tpu.matmul %227, %229, %cst_73 {dimension_numbers = #tpu.dot_dimension_numbers<[1], [0], [0], [1], [0, 0, 1, 1], [], []>} : vector<8x32xbf16>, vector<32x64xbf16>, vector<8x64xf32> -> vector<8x64xf32>
    %231 = vector.broadcast %159 : vector<1x64xf32> to vector<8x64xf32>
    %232 = arith.addf %230, %231 : vector<8x64xf32>
    %233 = arith.mulf %232, %232 : vector<8x64xf32>
    %234 = arith.mulf %232, %233 : vector<8x64xf32>
    %cst_74 = arith.constant 4.471500e-02 : f32
    %235 = vector.broadcast %cst_74 : f32 to vector<8x64xf32>
    %236 = arith.mulf %235, %234 : vector<8x64xf32>
    %237 = arith.addf %232, %236 : vector<8x64xf32>
    %cst_75 = arith.constant 0.797884583 : f32
    %238 = vector.broadcast %cst_75 : f32 to vector<8x64xf32>
    %239 = arith.mulf %238, %237 : vector<8x64xf32>
    %240 = math.tanh %239 : vector<8x64xf32>
    %cst_76 = arith.constant 1.000000e+00 : f32
    %241 = vector.broadcast %cst_76 : f32 to vector<8x64xf32>
    %242 = arith.addf %241, %240 : vector<8x64xf32>
    %cst_77 = arith.constant 5.000000e-01 : f32
    %243 = vector.broadcast %cst_77 : f32 to vector<8x64xf32>
    %244 = arith.mulf %243, %242 : vector<8x64xf32>
    %245 = arith.mulf %232, %244 : vector<8x64xf32>
    %246 = arith.truncf %245 : vector<8x64xf32> to vector<8x64xbf16>
    %c1_78 = arith.constant 1 : index
    %c0_79 = arith.constant 0 : index
    %c0_80 = arith.constant 0 : index
    %247 = vector.load %arg6[%c1_78, %c0_79, %c0_80] : memref<2x64x32xbf16, #tpu.memory_space<vmem>>, vector<1x64x32xbf16>
    %248 = vector.shape_cast %247 : vector<1x64x32xbf16> to vector<64x32xbf16>
    %cst_81 = arith.constant dense<0.000000e+00> : vector<8x32xf32>
    %249 = tpu.matmul %246, %248, %cst_81 {dimension_numbers = #tpu.dot_dimension_numbers<[1], [0], [0], [1], [0, 0, 1, 1], [], []>} : vector<8x64xbf16>, vector<64x32xbf16>, vector<8x32xf32> -> vector<8x32xf32>
    %250 = vector.broadcast %160 : vector<1x32xf32> to vector<8x32xf32>
    %251 = arith.addf %249, %250 : vector<8x32xf32>
    %252 = arith.addf %226, %251 : vector<8x32xf32>
    %cst_82 = arith.constant dense<0.000000e+00> : vector<8xf32>
    %253 = vector.multi_reduction <add>, %252, %cst_82 [1] : vector<8x32xf32> to vector<8xf32>
    %254 = vector.shape_cast %253 : vector<8xf32> to vector<8x1xf32>
    %cst_83 = arith.constant 3.200000e+01 : f32
    %255 = vector.broadcast %cst_83 : f32 to vector<8x1xf32>
    %256 = arith.divf %254, %255 : vector<8x1xf32>
    %257 = vector.broadcast %256 : vector<8x1xf32> to vector<8x32xf32>
    %258 = arith.subf %252, %257 : vector<8x32xf32>
    %259 = arith.mulf %258, %258 : vector<8x32xf32>
    %cst_84 = arith.constant dense<0.000000e+00> : vector<8xf32>
    %260 = vector.multi_reduction <add>, %259, %cst_84 [1] : vector<8x32xf32> to vector<8xf32>
    %261 = vector.shape_cast %260 : vector<8xf32> to vector<8x1xf32>
    %cst_85 = arith.constant 3.200000e+01 : f32
    %262 = vector.broadcast %cst_85 : f32 to vector<8x1xf32>
    %263 = arith.divf %261, %262 : vector<8x1xf32>
    %264 = vector.broadcast %256 : vector<8x1xf32> to vector<8x32xf32>
    %265 = arith.subf %252, %264 : vector<8x32xf32>
    %cst_86 = arith.constant 9.99999996E-13 : f32
    %266 = vector.broadcast %cst_86 : f32 to vector<8x1xf32>
    %267 = arith.addf %263, %266 : vector<8x1xf32>
    %268 = math.rsqrt %267 : vector<8x1xf32>
    %269 = vector.broadcast %268 : vector<8x1xf32> to vector<8x32xf32>
    %270 = arith.mulf %265, %269 : vector<8x32xf32>
    %271 = vector.broadcast %161 : vector<1x32xf32> to vector<8x32xf32>
    %272 = arith.mulf %270, %271 : vector<8x32xf32>
    %273 = vector.broadcast %162 : vector<1x32xf32> to vector<8x32xf32>
    %274 = arith.addf %272, %273 : vector<8x32xf32>
    %275 = vector.shape_cast %274 : vector<8x32xf32> to vector<1x8x32xf32>
    %276 = vector.extract_strided_slice %275 {offsets = [0, 0, 0], sizes = [1, 1, 32], strides = [1, 1, 1]} : vector<1x8x32xf32> to vector<1x1x32xf32>
    %277 = vector.shape_cast %276 : vector<1x1x32xf32> to vector<1x32xf32>
    %278 = arith.truncf %277 : vector<1x32xf32> to vector<1x32xbf16>
    %c0_87 = arith.constant 0 : index
    %c0_88 = arith.constant 0 : index
    %279 = vector.load %arg8[%c0_87, %c0_88] : memref<32x128xbf16, #tpu.memory_space<vmem>>, vector<32x128xbf16>
    %cst_89 = arith.constant dense<0.000000e+00> : vector<1x128xf32>
    %280 = tpu.matmul %278, %279, %cst_89 {dimension_numbers = #tpu.dot_dimension_numbers<[1], [0], [0], [1], [0, 0, 1, 1], [], []>} : vector<1x32xbf16>, vector<32x128xbf16>, vector<1x128xf32> -> vector<1x128xf32>
    %c0_90 = arith.constant 0 : index
    %c0_91 = arith.constant 0 : index
    %281 = vector.load %arg9[%c0_90, %c0_91] : memref<8x128xf32, #tpu.memory_space<vmem>>, vector<1x128xf32>
    %282 = arith.addf %280, %281 : vector<1x128xf32>
    %283 = math.tanh %282 : vector<1x128xf32>
    %284 = vector.shape_cast %283 : vector<1x128xf32> to vector<1x1x128xf32>
    %c0_92 = arith.constant 0 : index
    %c0_93 = arith.constant 0 : index
    %c0_94 = arith.constant 0 : index
    %285 = vector.load %arg10[%c0_92, %c0_93, %c0_94] : memref<1x1x128xf32, #tpu.memory_space<vmem>>, vector<1x1x128xf32>
    tpu.vector_store %arg10[%c0_92, %c0_93, %c0_94], %284 {strides = array<i32>} : memref<1x1x128xf32, #tpu.memory_space<vmem>>, vector<1x1x128xf32>,
    return
  }
  func.func @transform_0(%arg0: i32) -> (i32, i32, i32) {
    %c0_i32 = arith.constant 0 : i32
    %c0_i32_0 = arith.constant 0 : i32
    %c0_i32_1 = arith.constant 0 : i32
    return %arg0, %c0_i32, %c0_i32_0 : i32, i32, i32
  }
  func.func @transform_1(%arg0: i32) -> (i32, i32, i32) {
    %c0_i32 = arith.constant 0 : i32
    %c0_i32_0 = arith.constant 0 : i32
    %c0_i32_1 = arith.constant 0 : i32
    return %arg0, %c0_i32, %c0_i32_0 : i32, i32, i32
  }
  func.func @transform_2(%arg0: i32) -> (i32, i32, i32) {
    %c0_i32 = arith.constant 0 : i32
    %c0_i32_0 = arith.constant 0 : i32
    %c0_i32_1 = arith.constant 0 : i32
    %c0_i32_2 = arith.constant 0 : i32
    return %c0_i32, %c0_i32_0, %c0_i32_1 : i32, i32, i32
  }
  func.func @transform_3(%arg0: i32) -> (i32, i32, i32) {
    %c0_i32 = arith.constant 0 : i32
    %c0_i32_0 = arith.constant 0 : i32
    %c0_i32_1 = arith.constant 0 : i32
    %c0_i32_2 = arith.constant 0 : i32
    return %c0_i32, %c0_i32_0, %c0_i32_1 : i32, i32, i32
  }
  func.func @transform_4(%arg0: i32) -> (i32, i32, i32) {
    %c0_i32 = arith.constant 0 : i32
    %c0_i32_0 = arith.constant 0 : i32
    %c0_i32_1 = arith.constant 0 : i32
    %c0_i32_2 = arith.constant 0 : i32
    return %c0_i32, %c0_i32_0, %c0_i32_1 : i32, i32, i32
  }
  func.func @transform_5(%arg0: i32) -> (i32, i32, i32) {
    %c0_i32 = arith.constant 0 : i32
    %c0_i32_0 = arith.constant 0 : i32
    %c0_i32_1 = arith.constant 0 : i32
    %c0_i32_2 = arith.constant 0 : i32
    return %c0_i32, %c0_i32_0, %c0_i32_1 : i32, i32, i32
  }
  func.func @transform_6(%arg0: i32) -> (i32, i32, i32) {
    %c0_i32 = arith.constant 0 : i32
    %c0_i32_0 = arith.constant 0 : i32
    %c0_i32_1 = arith.constant 0 : i32
    %c0_i32_2 = arith.constant 0 : i32
    return %c0_i32, %c0_i32_0, %c0_i32_1 : i32, i32, i32
  }
  func.func @transform_7(%arg0: i32) -> (i32, i32) {
    %c0_i32 = arith.constant 0 : i32
    %c0_i32_0 = arith.constant 0 : i32
    %c0_i32_1 = arith.constant 0 : i32
    return %c0_i32, %c0_i32_0 : i32, i32
  }
  func.func @transform_8(%arg0: i32) -> (i32, i32) {
    %c0_i32 = arith.constant 0 : i32
    %c0_i32_0 = arith.constant 0 : i32
    %c0_i32_1 = arith.constant 0 : i32
    return %c0_i32, %c0_i32_0 : i32, i32
  }
  func.func @transform_9(%arg0: i32) -> (i32, i32, i32) {
    %c0_i32 = arith.constant 0 : i32
    %c0_i32_0 = arith.constant 0 : i32
    %c0_i32_1 = arith.constant 0 : i32
    return %arg0, %c0_i32, %c0_i32_0 : i32, i32, i32
  }
}

</mosaic_0001>

<bundles_post_ra>
// kernel: tpu_custom_call.1
= control target key start
LH: loop header
LB: loop body
LE: loop exit
PB: predicated region body
PF: predicated region fallthrough
CT: control target
= control target key end

     0   :  { %s3920_s0 = inlined_call_operand.hbm [shape: f32[2,8,32], index: 0, kind: input, shape index: {}]   ;;  %s3921_s1 = inlined_call_operand.hbm [shape: f32[2,1,8], index: 1, kind: input, shape index: {}]   ;;  %s3922_s2 = inlined_call_operand.vmem [shape: bf16[2,32,96], index: 2, kind: input, shape index: {}]   ;;  %s3923_s3 = inlined_call_operand.vmem [shape: bf16[2,32,32], index: 3, kind: input, shape index: {}]   ;;  %s3924_s4 = inlined_call_operand.vmem [shape: bf16[2,32,64], index: 4, kind: input, shape index: {}]   ;;  %s3925_s5 = inlined_call_operand.vmem [shape: bf16[2,64,32], index: 5, kind: input, shape index: {}]   ;;  %s3926_s6 = inlined_call_operand.hbm [shape: f32[2,8,96], index: 6, kind: input, shape index: {}]   ;;  %s3927_s7 = inlined_call_operand.hbm [shape: bf16[32,128], index: 7, kind: input, shape index: {}]   ;;  %s3928_s8 = inlined_call_operand.hbm [shape: f32[8,128], index: 8, kind: input, shape index: {}]   ;;  %s3929_s9 = inlined_call_operand.hbm [shape: f32[2,1,128], index: 9, kind: output, shape index: {}]  }
   0x1   :  { %3939 = sst [smem:[#allocation22_spill]] %s3926_s6 }
   0x2   :  { %3940 = sst [smem:[#allocation23_spill]] %s3927_s7 }
   0x3   :  { %3941 = sst [smem:[#allocation24_spill]] %s3928_s8 }
   0x4   :  { %14 = vsyncpa [#allocation3], 0 }
   0x5   :  { %16 = vsyncpa [#allocation3 + $0x1], 0 }
   0x6   :  { %17 = vsyncpa [#allocation6], 0 }
   0x7   :  { %19 = vsyncpa [#allocation6 + $0x1], 0 }
   0x8   :  { %20 = vsyncpa [#allocation9], 0 }
   0x9   :  { %21 = vsyncpa [#allocation4], 0 }
   0xa   :  { %23 = vsyncpa [#allocation4 + $0x1], 0  ;;  %s3136_s30 = smov 0   ;;  %s3138_s10 = smov 0  }
   0xb   :  { %s3140_s11 = smov 0   ;;  %s3142_s12 = smov 0  }
   0xc LB: > { %3942 = sst [smem:[#allocation17_spill]] %s3056_s11  ;;  %s3160_s16 = sadd.s32 4294967295, %s3060_s12   ;;  %s3060_s12 = sphi %s3142_s12, %s3964_s12   ;;  %s3056_s11 = sphi %s3140_s11, %s3966_s11   ;;  %s3052_s10 = sphi %s3138_s10, %s3968_s10   ;;  %s3048_s30 = sphi %s3136_s30, %s3967_s30  }
   0xd   : > { %3943 = sst [smem:[#allocation18_spill]] %s3060_s12  ;;  %p2505_p0 = scmp.ge.s32.totalorder %s3060_s12, 1 }
   0xe   : > { %s3944_s6 = sld [smem:[#allocation22_spill]]  ;;  %p50_p1 = scmp.eq.s32.totalorder %s3160_s16, 0 }
   0xf   : > { %p259_p2 = scmp.lt.s32.totalorder %s3060_s12, 3  ;;  %s3062_s18 = smov [#allocation7]  }
  0x10   : > { %s284_s19 = sshll.u32 %s3062_s18, 4  ;;  %s3946_s7 = sld [smem:[#allocation23_spill]]  ;;  %s285_s19 = int_to_ptr.vmem [resolvable:$true] %s284_s19 }
  0x11   : > { %p3165_p3 = pnand %p2505_p0, %p259_p2  ;;  %s3063_s24 = smov [#allocation8]  }
  0x12   : > { %s298_s25 = sshll.u32 %s3063_s24, 4  ;;  %s3064_s26 = smov 128   ;;  %s299_s25 = int_to_ptr.vmem [resolvable:$true] %s298_s25 }
  0x13   : > { %p2692_p4 = pneg %p3165_p3  ;;  %s3065_s27 = smov 8  }
  0x14   : > { %s282_s15 = sshll.u32 %s3944_s6, 4  ;;  %s3066_s28 = smov 64   ;;  %s283_s15 = int_to_ptr.hbm [resolvable:$true] %s282_s15 }
  0x15   : > { %p3177_p6 = pnand %p2692_p4, %p50_p1  ;;  %s3067_s29 = smov 4  }
  0x16   : > { %s296_s22 = sshll.u32 %s3946_s7, 4  ;;  %s3948_s8 = sld [smem:[#allocation24_spill]]  ;;  %s297_s22 = int_to_ptr.hbm [resolvable:$true] %s296_s22 }
  0x17   : > { %2695 = dma.hbm_to_vmem [thread:$0]  (!%p3177_p6), %s283_s15, 256, %s285_s19, [#allocation6], %s3064_s26, %s3064_s26, %s3065_s27  }
  0x18   : > { %2698 = dma.hbm_to_vmem [thread:$0]  (!%p3177_p6), %s297_s22, 256, %s299_s25, [#allocation9], %s3066_s28, %s3066_s28, %s3067_s29  }
  0x19   : > { %s3068_s20 = smov [#allocation10]   ;;  %s2504_s15 = sadd.s32 4294967294, %s3060_s12  }
  0x1a   : > { %s313_s21 = sshll.u32 %s3068_s20, 4  ;;  %s3192_s19 = sadd.s32 1, %s3060_s12   ;;  %s314_s21 = int_to_ptr.vmem [resolvable:$true] %s313_s21 }
  0x1b   : > { %3949 = sst [smem:[#allocation19_spill]] %s3192_s19  ;;  %s36_s24 = sadd.s32 1, %s3056_s11 }
  0x1c   : > { %s311_s18 = sshll.u32 %s3948_s8, 4  ;;  %s33_s22 = ssub.s32 %s3060_s12, %s3192_s19  ;;  %s312_s18 = int_to_ptr.hbm [resolvable:$true] %s311_s18 }
  0x1d   : > { %2701 = dma.hbm_to_vmem [thread:$0]  (!%p3177_p6), %s312_s18, 128, %s314_s21, [#allocation9]  }
  0x1e   : > { %p43_p7 = scmp.ne.s32.totalorder %s3056_s11, %s3052_s10  ;;  %p34_p8 = scmp.eq.s32.totalorder %s33_s22, 0 }
  0x1f   : > { %p44_p9 = scmp.eq.s32.totalorder %s3060_s12, 0  ;;  %p49_p10 = scmp.ne.s32.totalorder %s3052_s10, %s3048_s30 }
  0x20   : > { %p246_p11 = scmp.eq.s32.totalorder %s3160_s16, 1  ;;  %p252_p2 = scmp.eq.s32.totalorder %s2504_s15, 1 }
  0x21   : > { %s3204_s25 = scalar_select %p34_p8, %s3056_s11, %s36_s24  }
  0x22   : > { %p3206_p12 = por %p44_p9, %p43_p7  ;;  %p3212_p13 = por %p50_p1, %p49_p10 }
  0x23   : > { %3950 = sst [smem:[#allocation20_spill]] %s3204_s25  ;;  %p3216_p0 = por %p246_p11, %p43_p7 }
  0x24   : > { %p2716_p4 = scmp.lt.s32.totalorder %s3060_s12, 2  ;;  %s3222_s28 = sand.u32 1, %s3056_s11  }
  0x25   : > { %p3224_p6 = por %p252_p2, %p49_p10  ;;  %s2510_s13 = sshll.u32 %s3222_s28, 3 }
  0x26   : > { %s2511_s14 = sshll.u32 %s3060_s12, 3  ;;  %s328_s22 = scalar_lea.vmem [#allocation2], %s2510_s13 }
  0x27   : > { %s3954_s29 = scalar_select %p3224_p6, 1, 0 }
  0x28   : > { %s332_s21 = scalar_lea.hbm %s3920_s0, %s2511_s14  ;;  %s336_s6 = sshll.u32 %s328_s22, 4  ;;  %s337_s6 = int_to_ptr.vmem [resolvable:$true] %s336_s6 }
  0x29   : > { %3955 = sst [smem:[#allocation21_spill]] %s3954_s29  ;;  %s334_s24 = sshll.u32 %s332_s21, 4  ;;  %s335_s24 = int_to_ptr.hbm [resolvable:$true] %s334_s24 }
  0x2a   : > { %p3235_p7 = pnand %p2716_p4, %p3206_p12  ;;  %s343_s7 = sand.u32 1, %s3060_s12  }
  0x2b   : > { %s349_s11 = scalar_lea.hbm %s3921_s1, %s3060_s12  ;;  %s325_s19 = scalar_lea.sflag [#allocation3], %s3222_s28 }
  0x2c   : > { %s2922_s18 = sshra.s32 %s335_s24, 4  ;;  %p2926_p9 = pneg %p3235_p7  ;;  %s2923_s18 = int_to_ptr.hbm [resolvable:$true] %s2922_s18 }
  0x2d   : > { %s2924_s14 = scalar_lea.hbm %s2923_s18, 8  ;;  %s2929_s20 = scalar_lea.hbm %s3920_s0, 16 }
  0x2e   : > { %p2925_p8 = scmp.ne.s32.totalorder %s2923_s18, %s2924_s14  ;;  %p2930_p12 = scmp.lt.s32.totalorder %s2923_s18, %s3920_s0 }
  0x2f   : > { %p2931_p2 = scmp.lt.s32.totalorder %s2929_s20, %s2924_s14 }
  0x30   : > { %p2927_p10 = pnand %p2926_p9, %p2925_p8 }
  0x31   : > { %p2932_p4 = por %p2931_p2, %p2930_p12 }
  0x32   : > { %p2928_p11 = pneg %p2927_p10 }
  0x34   : > { %p2933_p5 = pnand %p2932_p4, %p2928_p11 }
  0x36   : > { %2936 = shalt.err (!%p2933_p5)
}
  0x37   : > { %2705 = dma.hbm_to_vmem [thread:$0]  (!%p3235_p7), %s335_s24, 128, %s337_s6, %s325_s19  }
  0x38   : > { %s351_s8 = sshll.u32 %s349_s11, 4  ;;  %s346_s25 = scalar_lea.vmem [#allocation5], %s3222_s28  ;;  %s352_s8 = int_to_ptr.hbm [resolvable:$true] %s351_s8 }
  0x39   : > { %s353_s12 = sshll.u32 %s346_s25, 4  ;;  %s344_s26 = scalar_lea.sflag [#allocation6], %s343_s7  ;;  %s354_s12 = int_to_ptr.vmem [resolvable:$true] %s353_s12 }
  0x3a   : > { %s2952_s13 = sshra.s32 %s352_s8, 4  ;;  %s2959_s20 = scalar_lea.hbm %s3921_s1, 2  ;;  %s2953_s13 = int_to_ptr.hbm [resolvable:$true] %s2952_s13 }
  0x3b   : > { %s2954_s29 = scalar_lea.hbm %s2953_s13, 1  ;;  %p2960_p5 = scmp.lt.s32.totalorder %s2953_s13, %s3921_s1 }
  0x3c   : > { %p2955_p8 = scmp.ne.s32.totalorder %s2953_s13, %s2954_s29  ;;  %p2961_p12 = scmp.lt.s32.totalorder %s2959_s20, %s2954_s29 }
  0x3e   : > { %p2957_p10 = pnand %p2955_p8, %p2926_p9  ;;  %p2962_p2 = por %p2961_p12, %p2960_p5 }
  0x40   : > { %p2958_p11 = pneg %p2957_p10 }
  0x42   : > { %p2963_p4 = pnand %p2962_p2, %p2958_p11 }
  0x44   : > { %2966 = shalt.err (!%p2963_p4)
}
  0x45   : > { %2708 = dma.hbm_to_vmem [thread:$0]  (!%p3235_p7), %s352_s8, 16, %s354_s12, %s344_s26  }
  0x46   : > { %362 = sbr.rel (%p3165_p3) target bundleno = 4348 (0x10fc), region = 56  ;;  %s3273_s7 = sand.u32 (!%p3165_p3), 1, %s3052_s10  }
  0x47   : > { %s2513_s11 = sshll.u32 (!%p3165_p3), %s3273_s7, 3  ;;  %s365_s19 = scalar_lea.sflag (!%p3165_p3), [#allocation3], %s3273_s7 }
  0x48   : > { %s368_s28 = scalar_lea.vmem (!%p3165_p3), [#allocation2], %s2513_s11 }
  0x4b   : > { %3027 = dma.done.wait (%p3212_p13), %s365_s19, 128  }
  0x4c   : > { %3029 = vsyncadd (%p3212_p13), %s365_s19, 4294967168  ;;  %s374_s12 = sand.u32 1, %s3160_s16   ;;  %s377_s29 = scalar_lea.vmem [#allocation5], %s3273_s7 }
  0x4d   : > { %s375_s17 = scalar_lea.sflag [#allocation6], %s374_s12 }
  0x4e   : > { %3031 = dma.done.wait (%p3212_p13), %s375_s17, 16  }
  0x4f   : > { %3033 = vsyncadd (%p3212_p13), %s375_s17, 4294967280 }
  0x50   : > { %3035 = dma.done.wait (%p50_p1), [#allocation6], 256  }
  0x51   : > { %3037 = vsyncadd (%p50_p1), [#allocation6], 4294967040 }
  0x52   : > { %3039 = dma.done.wait (%p50_p1), [#allocation9], 384  }
  0x53   : > { %3041 = vsyncadd (%p50_p1), [#allocation9], 4294966912  ;;  %vm435_vm0 = vcmask 261120   ;;  %v434_v0 = vld [vmem:[%s368_s28] sm:$0xff]  ;;  %v3069_v2 = vmov 32.0   ;;  %v3312_v32 = vld [vmem:[#allocation7] sm:$0xff] }
  0x54   : > { %v436_v1 = vsel %vm435_vm0, %v434_v0, 0.0  ;;  %2780 = vrcp.f32 %v3069_v2  ;;  %v2653_v14 = vld [vmem:[%s3922_s2 + $0x8] sm:$0xff]  ;;  %v2652_v15 = vld [vmem:[%s3922_s2] sm:$0xff]  ;;  %v2777_v25 = vld [vmem:[#allocation10 + $0x1] ss:$0 sm:$0xff]  ;;  %v476_v33 = vperm.slane %v3312_v32, 0 }
  0x55   : > { %437 = vadd.xlane.f32.xlu0 %v436_v1  ;;  %498 = vmatpush.bf16.msra.mxu0 %v2653_v14  ;;  %v2778_v28 = vld [vmem:[#allocation10 + $0x2] ss:$0 sm:$0xff]  ;;  %s3070_s8 = smov 104   ;;  %s3071_s25 = smov 96   ;;  %v3078_v42 = vmov 1983009808  }
  0x56   : > { %s3072_s26 = smov 88   ;;  %s3073_s13 = smov 72   ;;  %v545_v43 = vunpack.c.l.s4 %v3078_v42  ;;  %vm540_vm5 = vcmask 1047556   ;;  %v3079_v53 = vmov 1934713408   ;;  %vm886_vm6 = vcmask 64512  }
  0x57   : > { %s3074_s18 = smov 120   ;;  %s3075_s14 = smov 112   ;;  %v593_v54 = vunpack.c.l.s4 %v3079_v53  ;;  %vm1025_vm7 = vcmask 1043456   ;;  %vm1222_vm8 = vcmask 130048   ;;  %vm1224_vm9 = vcmask 195584  }
  0x58   : > { %s3076_s20 = smov 80   ;;  %s3077_s21 = smov 64   ;;  %v3336_v47 = vunpack.c.0.s8 %v545_v43  ;;  %vm1364_vm13 = vcmask 523264  }
  0x59   : > { %499 = vmatpush.bf16.msra.mxu0 %v2652_v15  ;;  %v3347_v2 = vunpack.c.0.s8 %v593_v54  ;;  %s3938_s6 = smov 48   ;;  %s3081_s11 = smov 40  }
  0x5a   : > { %v2781_v3 = vpop.eup %2780  ;;  %s3082_s19 = smov 56   ;;  %s3936_s28 = smov 24  }
  0x5b   : > { %v440_v4 = vmul.f32 32.0, %v2781_v3  ;;  %vm444_vm1 = vweird.f32 %v2781_v3  ;;  %s3937_s12 = smov 16   ;;  %s3935_s17 = smov 8  }
  0x5d   : > { %v441_v5 = vsub.f32 1.0, %v440_v4 }
  0x5f   : > { %v442_v6 = vmul.f32 %v2781_v3, %v441_v5 }
  0x61   : > { %v443_v7 = vadd.f32 %v2781_v3, %v442_v6 }
  0x63   : > { %v3296_v8 = vsel %vm444_vm1, %v2781_v3, %v443_v7 }
  0xc8   : > { %v438_v9 = vpop.xlane.xlu0 %437 }
  0xc9   : > { %v446_v10 = vmul.f32 %v3296_v8, %v438_v9 }
  0xcb   : > { %v447_v11 = vsub.f32 %v434_v0, %v446_v10 }
  0xcd   : > { %v448_v12 = vmul.f32 %v447_v11, %v447_v11 }
  0xcf   : > { %v449_v13 = vsel %vm435_vm0, %v448_v12, 0.0 }
  0xd0   : > { %450 = vadd.xlane.f32.xlu0 %v449_v13 }
 0x143   : > { %v451_v16 = vpop.xlane.xlu0 %450 }
 0x144   : > { %v452_v17 = vmul.f32 %v451_v16, %v3296_v8 }
 0x146   : > { %v453_v18 = vadd.f32 1e-12, %v452_v17 }
 0x148   : > { %2782 = vrsqrt.f32 %v453_v18  ;;  %vm460_vm3 = vweird.f32 %v453_v18 }
 0x14e   : > { %v2783_v19 = vpop.eup %2782 }
 0x14f   : > { %v455_v20 = vmul.f32 %v2783_v19, %v453_v18  ;;  %vm461_vm2 = vweird.f32 %v2783_v19 }
 0x150   : > { %vm462_vm4 = vmor %vm460_vm3, %vm461_vm2 }
 0x151   : > { %v456_v21 = vmul.f32 %v2783_v19, %v455_v20 }
 0x153   : > { %v457_v22 = vmul.f32 0.5, %v456_v21 }
 0x155   : > { %v458_v23 = vsub.f32 1.5, %v457_v22 }
 0x157   : > { %v459_v24 = vmul.f32 %v2783_v19, %v458_v23 }
 0x159   : > { %v463_v26 = vsel %vm462_vm4, %v2783_v19, %v459_v24 }
 0x15a   : > { %v464_v27 = vmul.f32 %v463_v26, %v447_v11 }
 0x15c   : > { %v466_v29 = vmul.f32 %v2777_v25, %v464_v27 }
 0x15e   : > { %v3307_v30 = vadd.f32 %v2778_v28, %v466_v29 }
 0x160   : > { %v471_v31 = vpack.c.bf16 %v3307_v30, %v3307_v30 }
 0x162   : > { %2525 = vmatmul.msk.bf16.vlgmr.msra.gmra.mxu0 %vm435_vm0, %v471_v31 }
 0x1df   : > { %v501_v34 = vpop.f32.mrf.mxu0 }
 0x1e0   : > { %v3315_v35 = vadd.f32 %v501_v34, %v476_v33 }
 0x1e2   : > { %512 = vrot.lane.b32.xlu0 %v3315_v35, %s3070_s8  ;;  %515 = vrot.lane.b32.xlu2 %v3315_v35, %s3071_s25  ;;  %v542_v46 = vrot.slane %v3315_v35, 4 }
 0x1e3   : > { %518 = vrot.lane.b32.xlu1 %v3315_v35, %s3072_s26 }
 0x1e7   : > { %v503_v36 = vpop.f32.mrf.mxu0 }
 0x1ea   : > { %524 = vrot.lane.b32.xlu2 %v3315_v35, %s3073_s13 }
 0x1eb   : > { %506 = vrot.lane.b32.xlu1 %v3315_v35, %s3074_s18 }
 0x1f2   : > { %509 = vrot.lane.b32.xlu2 %v3315_v35, %s3075_s14 }
 0x1f3   : > { %521 = vrot.lane.b32.xlu1 %v3315_v35, %s3076_s20 }
 0x1fb   : > { %527 = vrot.lane.b32.xlu1 %v3315_v35, %s3077_s21 }
 0x23c   : > { %v516_v37 = vpop.permute.xlu2 %515 }
 0x23d   : > { %v566_v7 = vrot.slane %v516_v37, 4 }
 0x244   : > { %v525_v38 = vpop.permute.xlu2 %524 }
 0x245   : > { %v576_v59 = vrot.slane %v525_v38, 4 }
 0x24c   : > { %v510_v39 = vpop.permute.xlu2 %509 }
 0x24d   : > { %v539_v41 = vrot.slane %v510_v39, 4  ;;  %v543_v48 = vsel %vm540_vm5, %v510_v39, %v542_v46 }
 0x24e   : > { %v551_v57 = vperm.slane %v543_v48, %v3336_v47 }
 0x24f   : > { %v541_v45 = vsel %vm540_vm5, %v539_v41, %v3315_v35 }
 0x250   : > { %v547_v51 = vperm.slane %v541_v45, %v3336_v47  ;;  %v602_v3 = vrot.slane %v551_v57, 4 }
 0x252   : > { %v590_v62 = vrot.slane %v547_v51, 4 }
 0x254   : > { %v513_v44 = vpop.permute.xlu0 %512 }
 0x255   : > { %v519_v40 = vpop.permute.xlu1 %518  ;;  %v552_v49 = vrot.slane %v513_v44, 4 }
 0x256   : > { %v578_v50 = vrot.slane %v519_v40, 4  ;;  %v577_v1 = vsel %vm540_vm5, %v576_v59, %v519_v40 }
 0x257   : > { %v583_v9 = vperm.slane %v577_v1, %v3336_v47 }
 0x258   : > { %v579_v60 = vsel %vm540_vm5, %v525_v38, %v578_v50 }
 0x259   : > { %v587_v4 = vperm.slane %v579_v60, %v3336_v47  ;;  %v612_v23 = vrot.slane %v583_v9, 4 }
 0x25b   : > { %v624_v16 = vrot.slane %v587_v4, 4 }
 0x25d   : > { %v507_v52 = vpop.permute.xlu1 %506 }
 0x25e   : > { %v553_v55 = vsel %vm540_vm5, %v552_v49, %v507_v52  ;;  %v554_v56 = vrot.slane %v507_v52, 4 }
 0x25f   : > { %v559_v58 = vperm.slane %v553_v55, %v3336_v47 }
 0x260   : > { %v555_v61 = vsel %vm540_vm5, %v513_v44, %v554_v56 }
 0x261   : > { %v563_v63 = vperm.slane %v555_v61, %v3336_v47  ;;  %v588_v0 = vrot.slane %v559_v58, 4  ;;  %v591_v5 = vsel %vm540_vm5, %v559_v58, %v590_v62 }
 0x262   : > { %v599_v14 = vperm.slane %v591_v5, %v3347_v2 }
 0x263   : > { %v600_v6 = vrot.slane %v563_v63, 4  ;;  %v589_v10 = vsel %vm540_vm5, %v588_v0, %v547_v51  ;;  %v603_v12 = vsel %vm540_vm5, %v563_v63, %v602_v3 }
 0x264   : > { %v595_v19 = vperm.slane %v589_v10, %v3347_v2  ;;  %v611_v20 = vperm.slane %v603_v12, %v3347_v2  ;;  %v642_v25 = vrot.slane %v599_v14, 4 }
 0x265   : > { %v601_v11 = vsel %vm540_vm5, %v600_v6, %v551_v57  ;;  %v522_v13 = vpop.permute.xlu1 %521 }
 0x266   : > { %v564_v15 = vrot.slane %v522_v13, 4  ;;  %v607_v17 = vperm.slane %v601_v11, %v3347_v2  ;;  %v567_v18 = vsel %vm540_vm5, %v522_v13, %v566_v7  ;;  %v638_v34 = vrot.slane %v595_v19, 4 }
 0x267   : > { %v575_v22 = vperm.slane %v567_v18, %v3336_v47  ;;  %v650_v36 = vrot.slane %v611_v20, 4 }
 0x268   : > { %v565_v21 = vsel %vm540_vm5, %v564_v15, %v516_v37  ;;  %v646_v28 = vrot.slane %v607_v17, 4 }
 0x269   : > { %v571_v24 = vperm.slane %v565_v21, %v3336_v47  ;;  %v625_v26 = vsel %vm540_vm5, %v624_v16, %v575_v22  ;;  %v626_v27 = vrot.slane %v575_v22, 4 }
 0x26a   : > { %v631_v33 = vperm.slane %v625_v26, %v3347_v2 }
 0x26b   : > { %v613_v29 = vsel %vm540_vm5, %v612_v23, %v571_v24  ;;  %v614_v31 = vrot.slane %v571_v24, 4  ;;  %v627_v37 = vsel %vm540_vm5, %v587_v4, %v626_v27 }
 0x26c   : > { %v619_v38 = vperm.slane %v613_v29, %v3347_v2  ;;  %v635_v40 = vperm.slane %v627_v37, %v3347_v2  ;;  %v644_v41 = vrot.slane %v631_v33, 4  ;;  %v647_v42 = vsel %vm540_vm5, %v631_v33, %v646_v28 }
 0x26d   : > { %v615_v39 = vsel %vm540_vm5, %v583_v9, %v614_v31  ;;  %v746_v46 = vrot.slane %v647_v42, 4 }
 0x26e   : > { %v623_v43 = vperm.slane %v615_v39, %v3347_v2  ;;  %v636_v44 = vrot.slane %v619_v38, 4  ;;  %v639_v45 = vsel %vm540_vm5, %v619_v38, %v638_v34  ;;  %v645_v48 = vsel %vm540_vm5, %v644_v41, %v607_v17 }
 0x26f   : > { %v648_v49 = vrot.slane %v635_v40, 4  ;;  %v651_v50 = vsel %vm540_vm5, %v635_v40, %v650_v36  ;;  %v722_v51 = vrot.slane %v639_v45, 4  ;;  %v734_v53 = vrot.slane %v645_v48, 4 }
 0x270   : > { %v640_v52 = vrot.slane %v623_v43, 4  ;;  %v744_v54 = vrot.slane %v651_v50, 4  ;;  %v637_v56 = vsel %vm540_vm5, %v636_v44, %v595_v19  ;;  %v643_v57 = vsel %vm540_vm5, %v623_v43, %v642_v25 }
 0x271   : > { %v649_v55 = vsel %vm540_vm5, %v648_v49, %v611_v20  ;;  %v747_v58 = vsel %vm540_vm5, %v651_v50, %v746_v46  ;;  %v710_v62 = vrot.slane %v637_v56, 4  ;;  %v720_v1 = vrot.slane %v643_v57, 4 }
 0x272   : > { %v732_v59 = vrot.slane %v649_v55, 4  ;;  %v745_v60 = vsel %vm540_vm5, %v744_v54, %v647_v42  ;;  %v641_v61 = vsel %vm540_vm5, %v640_v52, %v599_v14  ;;  %v723_v3 = vsel %vm540_vm5, %v643_v57, %v722_v51 }
 0x273   : > { %v751_v63 = vperm.slane %v745_v60, %v3336_v47  ;;  %v708_v0 = vrot.slane %v641_v61, 4  ;;  %v711_v5 = vsel %vm540_vm5, %v641_v61, %v710_v62  ;;  %v731_v6 = vperm.slane %v723_v3, %v3336_v47 }
 0x274   : > { %v733_v4 = vsel %vm540_vm5, %v732_v59, %v645_v48  ;;  %v735_v7 = vsel %vm540_vm5, %v649_v55, %v734_v53  ;;  %v719_v9 = vperm.slane %v711_v5, %v3336_v47  ;;  %v755_v11 = vperm.slane %v747_v58, %v3336_v47 }
 0x275   : > { %v743_v10 = vperm.slane %v735_v7, %v3336_v47  ;;  %v709_v12 = vsel %vm540_vm5, %v708_v0, %v637_v56  ;;  %v768_v13 = vrot.slane %v731_v6, 4  ;;  %v721_v15 = vsel %vm540_vm5, %v720_v1, %v639_v45 }
 0x276   : > { %v715_v14 = vperm.slane %v709_v12, %v3336_v47  ;;  %v739_v16 = vperm.slane %v733_v4, %v3336_v47  ;;  %v792_v17 = vrot.slane %v755_v11, 4  ;;  %v770_v18 = vrot.slane %v719_v9, 4 }
 0x277   : > { %v794_v19 = vrot.slane %v743_v10, 4  ;;  %v727_v20 = vperm.slane %v721_v15, %v3336_v47  ;;  %v769_v21 = vsel %vm540_vm5, %v768_v13, %v719_v9  ;;  %v780_v22 = vrot.slane %v751_v63, 4 }
 0x278   : > { %v758_v23 = vrot.slane %v715_v14, 4  ;;  %v782_v24 = vrot.slane %v739_v16, 4  ;;  %v775_v25 = vperm.slane %v769_v21, %v3347_v2  ;;  %v793_v26 = vsel %vm540_vm5, %v792_v17, %v743_v10 }
 0x279   : > { %v771_v27 = vsel %vm540_vm5, %v731_v6, %v770_v18  ;;  %v795_v28 = vsel %vm540_vm5, %v755_v11, %v794_v19  ;;  %v799_v29 = vperm.slane %v793_v26, %v3347_v2  ;;  %v756_v34 = vrot.slane %v727_v20, 4  ;;  %v2779_v11 = vld [vmem:[%s377_s29] ss:$0 sm:$0xff] }
 0x27a   : > { %v779_v31 = vperm.slane %v771_v27, %v3347_v2  ;;  %v803_v33 = vperm.slane %v795_v28, %v3347_v2  ;;  %v814_v36 = vrot.slane %v775_v25, 4  ;;  %v781_v38 = vsel %vm540_vm5, %v780_v22, %v739_v16 }
 0x27b   : > { %v759_v37 = vsel %vm540_vm5, %v727_v20, %v758_v23  ;;  %v783_v39 = vsel %vm540_vm5, %v751_v63, %v782_v24  ;;  %v812_v40 = vrot.slane %v799_v29, 4  ;;  %v757_v43 = vsel %vm540_vm5, %v756_v34, %v715_v14  ;;  %v528_v34 = vpop.permute.xlu1 %527 }
 0x27c   : > { %v816_v41 = vrot.slane %v803_v33, 4  ;;  %v818_v42 = vrot.slane %v779_v31, 4  ;;  %v815_v44 = vsel %vm540_vm5, %v799_v29, %v814_v36  ;;  %v763_v45 = vperm.slane %v757_v43, %v3347_v2 }
 0x27d   : > { %v787_v46 = vperm.slane %v781_v38, %v3347_v2  ;;  %v767_v48 = vperm.slane %v759_v37, %v3347_v2  ;;  %v813_v49 = vsel %vm540_vm5, %v812_v40, %v775_v25  ;;  %v879_v50 = vpack.c.bf16 %v815_v44, %v815_v44 }
 0x27e   : > { %v817_v51 = vsel %vm540_vm5, %v816_v41, %v779_v31  ;;  %v819_v52 = vsel %vm540_vm5, %v803_v33, %v818_v42  ;;  %v878_v53 = vpack.c.bf16 %v813_v49, %v813_v49  ;;  %v806_v58 = vrot.slane %v763_v45, 4 }
 0x27f   : > { %v880_v54 = vpack.c.bf16 %v817_v51, %v817_v51  ;;  %v881_v55 = vpack.c.bf16 %v819_v52, %v819_v52  ;;  %v910_v56 = vsel %vm886_vm6, %v879_v50, 0  ;;  %v804_v57 = vrot.slane %v787_v46, 4 }
 0x280   : > { %v791_v59 = vperm.slane %v783_v39, %v3347_v2  ;;  %v891_v60 = vsel %vm886_vm6, %v878_v53, 0  ;;  %919 = vmatpush.bf16.xpose.msra.mxu2 %v910_v56  ;;  %v810_v63 = vrot.slane %v767_v48, 4  ;;  %v807_v1 = vsel %vm540_vm5, %v787_v46, %v806_v58 }
 0x281   : > { %v929_v61 = vsel %vm886_vm6, %v880_v54, 0  ;;  %v948_v62 = vsel %vm886_vm6, %v881_v55, 0  ;;  %900 = vmatpush.bf16.xpose.msra.mxu1 %v891_v60  ;;  %v805_v3 = vsel %vm540_vm5, %v804_v57, %v763_v45  ;;  %v875_v6 = vpack.c.bf16 %v807_v1, %v807_v1 }
 0x282   : > { %938 = vmatpush.bf16.xpose.msra.mxu3 %v929_v61  ;;  %v808_v0 = vrot.slane %v791_v59, 4  ;;  %957 = vmatpush.bf16.xpose.msrb.mxu0 %v948_v62  ;;  %v811_v5 = vsel %vm540_vm5, %v791_v59, %v810_v63  ;;  %v874_v7 = vpack.c.bf16 %v805_v3, %v805_v3  ;;  %v654_v56 = vrot.slane %v528_v34, 4 }
 0x283   : > { %v877_v10 = vpack.c.bf16 %v811_v5, %v811_v5 }
 0x284   : > { %v809_v4 = vsel %vm540_vm5, %v808_v0, %v767_v48 }
 0x285   : > { %v876_v9 = vpack.c.bf16 %v809_v4, %v809_v4 }
 0x287   : > { %2527 = vmatmul.msk.bf16.vlgmr.msra.gmra.mxu2 %vm886_vm6, %v875_v6 }
 0x288   : > { %2526 = vmatmul.msk.bf16.vlgmr.msra.gmra.mxu1 %vm886_vm6, %v874_v7 }
 0x289   : > { %2528 = vmatmul.msk.bf16.vlgmr.msra.gmra.mxu3 %vm886_vm6, %v876_v9  ;;  %2529 = vmatmul.msk.bf16.vlgmr.msrb.gmra.mxu0 %vm886_vm6, %v877_v10 }
 0x305   : > { %v902_v12 = vpop.f32.mrf.mxu1 }
 0x306   : > { %v963_v13 = vmul.f32 0.35355338, %v902_v12  ;;  %v959_v14 = vpop.f32.mrf.mxu0 }
 0x307   : > { %v966_v15 = vmul.f32 0.35355338, %v959_v14 }
 0x308   : > { %v970_v16 = vadd.f32 %v2779_v11, %v963_v13 }
 0x309   : > { %v973_v17 = vadd.f32 %v2779_v11, %v966_v15 }
 0x30a   : > { %v974_v18 = vsel %vm886_vm6, %v970_v16, -inf  ;;  %v921_v19 = vpop.f32.mrf.mxu2 }
 0x30b   : > { %975 = vmax.xlane.f32.xlu0 %v974_v18  ;;  %v964_v20 = vmul.f32 0.35355338, %v921_v19  ;;  %v983_v22 = vsel %vm886_vm6, %v973_v17, -inf }
 0x30c   : > { %v940_v21 = vpop.f32.mrf.mxu3  ;;  %984 = vmax.xlane.f32.xlu2 %v983_v22 }
 0x30d   : > { %v965_v23 = vmul.f32 0.35355338, %v940_v21  ;;  %v904_v24 = vpop.f32.mrf.mxu1  ;;  %v971_v27 = vadd.f32 %v2779_v11, %v964_v20 }
 0x30e   : > { %v961_v25 = vpop.f32.mrf.mxu0 }
 0x30f   : > { %v972_v26 = vadd.f32 %v2779_v11, %v965_v23  ;;  %v977_v33 = vsel %vm886_vm6, %v971_v27, -inf }
 0x311   : > { %v980_v28 = vsel %vm886_vm6, %v972_v26, -inf }
 0x312   : > { %981 = vmax.xlane.f32.xlu1 %v980_v28  ;;  %v923_v29 = vpop.f32.mrf.mxu2 }
 0x314   : > { %v942_v31 = vpop.f32.mrf.mxu3  ;;  %978 = vmax.xlane.f32.xlu2 %v977_v33 }
 0x31f   : > { %533 = vrot.lane.b32.xlu0 %v3315_v35, %s3938_s6 }
 0x32b   : > { %536 = vrot.lane.b32.xlu1 %v3315_v35, %s3081_s11 }
 0x32c   : > { %530 = vrot.lane.b32.xlu2 %v3315_v35, %s3082_s19 }
 0x37e   : > { %v976_v36 = vpop.xlane.xlu0 %975 }
 0x37f   : > { %v986_v38 = vsub.f32 %v970_v16, %v976_v36  ;;  %v985_v37 = vpop.xlane.xlu2 %984 }
 0x380   : > { %v989_v42 = vsub.f32 %v973_v17, %v985_v37 }
 0x381   : > { %v990_v39 = vmul.f32 1.442695, %v986_v38 }
 0x382   : > { %v996_v35 = vmul.f32 1.442695, %v989_v42 }
 0x383   : > { %2784 = vpow2.f32 %v990_v39 }
 0x385   : > { %v982_v40 = vpop.xlane.xlu1 %981 }
 0x386   : > { %v988_v41 = vsub.f32 %v972_v26, %v982_v40 }
 0x387   : > { %v979_v44 = vpop.xlane.xlu2 %978 }
 0x388   : > { %v994_v43 = vmul.f32 1.442695, %v988_v41  ;;  %v987_v45 = vsub.f32 %v971_v27, %v979_v44 }
 0x389   : > { %v3439_v46 = vpop.eup %2784 }
 0x38a   : > { %2786 = vpow2.f32 %v994_v43  ;;  %v992_v48 = vmul.f32 1.442695, %v987_v45  ;;  %v998_v49 = vsel %vm886_vm6, %v3439_v46, 0.0 }
 0x38b   : > { %999 = vadd.xlane.f32.xlu1 %v998_v49 }
 0x38c   : > { %2788 = vpow2.f32 %v992_v48 }
 0x38d   : > { %2790 = vpow2.f32 %v996_v35 }
 0x38f   : > { %v531_v59 = vpop.permute.xlu2 %530 }
 0x390   : > { %v3443_v50 = vpop.eup %2786  ;;  %v666_v63 = vrot.slane %v531_v59, 4 }
 0x391   : > { %v1004_v51 = vsel %vm886_vm6, %v3443_v50, 0.0  ;;  %v534_v53 = vpop.permute.xlu0 %533 }
 0x392   : > { %1005 = vadd.xlane.f32.xlu2 %v1004_v51  ;;  %v3447_v52 = vpop.eup %2788  ;;  %v652_v57 = vrot.slane %v534_v53, 4  ;;  %v655_v58 = vsel %vm540_vm5, %v534_v53, %v654_v56 }
 0x393   : > { %v1001_v54 = vsel %vm886_vm6, %v3447_v52, 0.0  ;;  %v3451_v55 = vpop.eup %2790  ;;  %v663_v62 = vperm.slane %v655_v58, %v3336_v47 }
 0x394   : > { %1002 = vadd.xlane.f32.xlu0 %v1001_v54  ;;  %v1007_v60 = vsel %vm886_vm6, %v3451_v55, 0.0  ;;  %v653_v61 = vsel %vm540_vm5, %v652_v57, %v528_v34 }
 0x395   : > { %v659_v0 = vperm.slane %v653_v61, %v3336_v47  ;;  %v690_v5 = vrot.slane %v663_v62, 4 }
 0x397   : > { %v678_v9 = vrot.slane %v659_v0, 4 }
 0x39a   : > { %1008 = vadd.xlane.f32.xlu2 %v1007_v60 }
 0x39d   : > { %v537_v1 = vpop.permute.xlu1 %536 }
 0x39e   : > { %v664_v3 = vrot.slane %v537_v1, 4  ;;  %v667_v4 = vsel %vm540_vm5, %v537_v1, %v666_v63 }
 0x39f   : > { %v675_v6 = vperm.slane %v667_v4, %v3336_v47 }
 0x3a0   : > { %v665_v7 = vsel %vm540_vm5, %v664_v3, %v531_v59 }
 0x3a1   : > { %v671_v10 = vperm.slane %v665_v7, %v3336_v47  ;;  %v688_v11 = vrot.slane %v675_v6, 4  ;;  %v691_v12 = vsel %vm540_vm5, %v675_v6, %v690_v5 }
 0x3a2   : > { %v699_v13 = vperm.slane %v691_v12, %v3347_v2 }
 0x3a3   : > { %v676_v14 = vrot.slane %v671_v10, 4  ;;  %v679_v15 = vsel %vm540_vm5, %v671_v10, %v678_v9  ;;  %v689_v16 = vsel %vm540_vm5, %v688_v11, %v663_v62 }
 0x3a4   : > { %v687_v17 = vperm.slane %v679_v15, %v3347_v2  ;;  %v695_v18 = vperm.slane %v689_v16, %v3347_v2  ;;  %v706_v19 = vrot.slane %v699_v13, 4 }
 0x3a5   : > { %v677_v20 = vsel %vm540_vm5, %v676_v14, %v659_v0 }
 0x3a6   : > { %v683_v21 = vperm.slane %v677_v20, %v3347_v2  ;;  %v702_v22 = vrot.slane %v687_v17, 4  ;;  %v704_v23 = vrot.slane %v695_v18, 4  ;;  %v707_v24 = vsel %vm540_vm5, 0.0, %v706_v19 }
 0x3a7   : > { %v831_v25 = vsel %vm540_vm5, %v706_v19, %v695_v18  ;;  %v836_v26 = vrot.slane %v707_v24, 4 }
 0x3a8   : > { %v700_v27 = vrot.slane %v683_v21, 4  ;;  %v703_v28 = vsel %vm540_vm5, 0.0, %v702_v22  ;;  %v705_v29 = vsel %vm540_vm5, 0.0, %v704_v23  ;;  %v835_v31 = vperm.slane %v831_v25, %v3336_v47 }
 0x3a9   : > { %v825_v33 = vrot.slane %v703_v28, 4  ;;  %v837_v34 = vsel %vm540_vm5, %v836_v26, %v705_v29  ;;  %v820_v36 = vsel %vm540_vm5, %v702_v22, %v683_v21 }
 0x3aa   : > { %v701_v38 = vsel %vm540_vm5, 0.0, %v700_v27  ;;  %v824_v37 = vperm.slane %v820_v36, %v3336_v47  ;;  %v841_v39 = vperm.slane %v837_v34, %v3336_v47  ;;  %v856_v40 = vrot.slane %v835_v31, 4 }
 0x3ab   : > { %v826_v41 = vsel %vm540_vm5, %v825_v33, %v701_v38 }
 0x3ac   : > { %v830_v42 = vperm.slane %v826_v41, %v3336_v47  ;;  %v844_v43 = vrot.slane %v824_v37, 4  ;;  %v857_v44 = vsel %vm540_vm5, %v841_v39, %v856_v40  ;;  %v854_v45 = vrot.slane %v841_v39, 4 }
 0x3ad   : > { %v865_v48 = vperm.slane %v857_v44, %v3347_v2 }
 0x3ae   : > { %v845_v49 = vsel %vm540_vm5, %v830_v42, %v844_v43  ;;  %v842_v35 = vrot.slane %v830_v42, 4  ;;  %v855_v51 = vsel %vm540_vm5, %v854_v45, %v835_v31 }
 0x3af   : > { %v853_v53 = vperm.slane %v845_v49, %v3347_v2  ;;  %v870_v54 = vrot.slane %v865_v48, 4  ;;  %v861_v56 = vperm.slane %v855_v51, %v3347_v2 }
 0x3b0   : > { %v843_v57 = vsel %vm540_vm5, %v842_v35, %v824_v37 }
 0x3b1   : > { %v871_v58 = vsel %vm540_vm5, %v870_v54, %v853_v53  ;;  %v872_v59 = vrot.slane %v853_v53, 4  ;;  %v849_v60 = vperm.slane %v843_v57, %v3347_v2  ;;  %v866_v61 = vrot.slane %v861_v56, 4 }
 0x3b2   : > { %v884_v62 = vpack.c.bf16 %v871_v58, %v871_v58 }
 0x3b3   : > { %v867_v63 = vsel %vm540_vm5, %v866_v61, %v849_v60  ;;  %v873_v0 = vsel %vm540_vm5, %v865_v48, %v872_v59  ;;  %v868_v1 = vrot.slane %v849_v60, 4 }
 0x3b4   : > { %v1065_v3 = vsel %vm1025_vm7, %v884_v62, 0  ;;  %v882_v4 = vpack.c.bf16 %v867_v63, %v867_v63  ;;  %v885_v5 = vpack.c.bf16 %v873_v0, %v873_v0 }
 0x3b5   : > { %1074 = vmatpush.bf16.msrb.mxu3 %v1065_v3  ;;  %v869_v6 = vsel %vm540_vm5, %v861_v56, %v868_v1 }
 0x3b6   : > { %v1027_v7 = vsel %vm1025_vm7, %v882_v4, 0  ;;  %v1084_v9 = vsel %vm1025_vm7, %v885_v5, 0  ;;  %v883_v10 = vpack.c.bf16 %v869_v6, %v869_v6 }
 0x3b7   : > { %1036 = vmatpush.bf16.msrb.mxu1 %v1027_v7  ;;  %1093 = vmatpush.bf16.msra.mxu0 %v1084_v9 }
 0x3b8   : > { %v1046_v11 = vsel %vm1025_vm7, %v883_v10, 0 }
 0x3b9   : > { %1055 = vmatpush.bf16.msrb.mxu2 %v1046_v11 }
 0x3fe   : > { %v1000_v12 = vpop.xlane.xlu1 %999 }
 0x3ff   : > { %2792 = vrcp.f32 %v1000_v12 }
 0x405   : > { %v1006_v13 = vpop.xlane.xlu2 %1005  ;;  %v2793_v14 = vpop.eup %2792 }
 0x406   : > { %2794 = vrcp.f32 %v1006_v13  ;;  %v1014_v15 = vmul.f32 %v2793_v14, %v3439_v46 }
 0x407   : > { %v1003_v16 = vpop.xlane.xlu0 %1002 }
 0x408   : > { %v1018_v17 = vpack.c.bf16 %v1014_v15, %v1014_v15  ;;  %2796 = vrcp.f32 %v1003_v16 }
 0x40a   : > { %2530 = vmatmul.msk.bf16.vlgmr.msrb.gmra.mxu1 %vm886_vm6, %v1018_v17 }
 0x40c   : > { %v2795_v18 = vpop.eup %2794 }
 0x40d   : > { %v1016_v19 = vmul.f32 %v2795_v18, %v3443_v50  ;;  %v1009_v20 = vpop.xlane.xlu2 %1008 }
 0x40e   : > { %2798 = vrcp.f32 %v1009_v20  ;;  %v2797_v21 = vpop.eup %2796 }
 0x40f   : > { %v1020_v22 = vpack.c.bf16 %v1016_v19, %v1016_v19  ;;  %v1015_v23 = vmul.f32 %v2797_v21, %v3447_v52 }
 0x411   : > { %2532 = vmatmul.msk.bf16.vlgmr.msrb.gmra.mxu3 %vm886_vm6, %v1020_v22  ;;  %v1019_v24 = vpack.c.bf16 %v1015_v23, %v1015_v23 }
 0x413   : > { %2531 = vmatmul.msk.bf16.vlgmr.msrb.gmra.mxu2 %vm886_vm6, %v1019_v24 }
 0x414   : > { %v2799_v25 = vpop.eup %2798 }
 0x415   : > { %v1017_v46 = vmul.f32 %v2799_v25, %v3451_v55 }
 0x417   : > { %v1021_v26 = vpack.c.bf16 %v1017_v46, %v1017_v46 }
 0x419   : > { %2533 = vmatmul.msk.bf16.vlgmr.msra.gmra.mxu0 %vm886_vm6, %v1021_v26 }
 0x487   : > { %v1038_v27 = vpop.f32.mrf.mxu1 }
 0x488   : > { %v1101_v50 = vrot.slane %v1038_v27, 4 }
 0x48f   : > { %v1040_v28 = vpop.f32.mrf.mxu1 }
 0x494   : > { %v1076_v29 = vpop.f32.mrf.mxu3 }
 0x495   : > { %v1099_v31 = vrot.slane %v1076_v29, 4  ;;  %v1102_v33 = vsel %vm540_vm5, %v1076_v29, %v1101_v50 }
 0x496   : > { %v1095_v34 = vpop.f32.mrf.mxu0  ;;  %v1110_v36 = vperm.slane %v1102_v33, %v3336_v47  ;;  %v1057_v37 = vpop.f32.mrf.mxu2 }
 0x497   : > { %v1100_v52 = vsel %vm540_vm5, %v1099_v31, %v1038_v27  ;;  %v1111_v38 = vrot.slane %v1095_v34, 4  ;;  %v1113_v55 = vrot.slane %v1057_v37, 4 }
 0x498   : > { %v1106_v39 = vperm.slane %v1100_v52, %v3336_v47  ;;  %v1137_v44 = vrot.slane %v1110_v36, 4 }
 0x499   : > { %v1112_v40 = vsel %vm540_vm5, %v1111_v38, %v1057_v37  ;;  %v1114_v42 = vsel %vm540_vm5, %v1095_v34, %v1113_v55  ;;  %v2654_v55 = vld [vmem:[%s3923_s3] sm:$0xff] }
 0x49a   : > { %v1125_v41 = vrot.slane %v1106_v39, 4  ;;  %v1118_v43 = vperm.slane %v1112_v40, %v3336_v47  ;;  %v1122_v45 = vperm.slane %v1114_v42, %v3336_v47 }
 0x49c   : > { %v1123_v48 = vrot.slane %v1118_v43, 4  ;;  %v1126_v49 = vsel %vm540_vm5, %v1118_v43, %v1125_v41  ;;  %v1078_v35 = vpop.f32.mrf.mxu3  ;;  %v1135_v53 = vrot.slane %v1122_v45, 4  ;;  %v1138_v54 = vsel %vm540_vm5, %v1122_v45, %v1137_v44 }
 0x49d   : > { %v1134_v51 = vperm.slane %v1126_v49, %v3347_v2  ;;  %v1146_v57 = vperm.slane %v1138_v54, %v3347_v2  ;;  %v1231_v49 = vperm.slane %v3312_v32, 1 }
 0x49e   : > { %v1124_v56 = vsel %vm540_vm5, %v1123_v48, %v1106_v39  ;;  %v1097_v58 = vpop.f32.mrf.mxu0  ;;  %v1136_v60 = vsel %vm540_vm5, %v1135_v53, %v1110_v36  ;;  %v1059_v62 = vpop.f32.mrf.mxu2  ;;  %v2655_v39 = vld [vmem:[%s3923_s3 + $0x8] sm:$0xff] }
 0x49f   : > { %v1130_v59 = vperm.slane %v1124_v56, %v3347_v2  ;;  %v1149_v61 = vrot.slane %v1134_v51, 4  ;;  %v1142_v63 = vperm.slane %v1136_v60, %v3347_v2  ;;  %v1153_v0 = vrot.slane %v1146_v57, 4  ;;  %1253 = vmatpush.bf16.msra.mxu1 %v2655_v39  ;;  %v2657_v62 = vld [vmem:[%s3924_s4 + $0x8] sm:$0xff] }
 0x4a0   : > { %1314 = vmatpush.bf16.msra.mxu2 %v2657_v62 }
 0x4a1   : > { %v1147_v1 = vrot.slane %v1130_v59, 4  ;;  %v1150_v3 = vsel %vm540_vm5, 0.0, %v1149_v61  ;;  %v1155_v4 = vsel %vm540_vm5, %v1149_v61, %v1130_v59  ;;  %v1151_v5 = vrot.slane %v1142_v63, 4 }
 0x4a2   : > { %v1154_v6 = vsel %vm540_vm5, 0.0, %v1153_v0  ;;  %v1159_v7 = vperm.slane %v1155_v4, %v3336_v47  ;;  %v1160_v9 = vrot.slane %v1150_v3, 4  ;;  %v1166_v12 = vsel %vm540_vm5, %v1153_v0, %v1142_v63 }
 0x4a3   : > { %v1148_v10 = vsel %vm540_vm5, 0.0, %v1147_v1  ;;  %v1171_v11 = vrot.slane %v1154_v6, 4  ;;  %v1152_v13 = vsel %vm540_vm5, 0.0, %v1151_v5  ;;  %v1170_v15 = vperm.slane %v1166_v12, %v3336_v47  ;;  %1254 = vmatpush.bf16.msra.mxu1 %v2654_v55 }
 0x4a4   : > { %v1161_v14 = vsel %vm540_vm5, %v1160_v9, %v1148_v10  ;;  %v1179_v16 = vrot.slane %v1159_v7, 4  ;;  %v1283_v10 = vperm.slane %v3312_v32, 2  ;;  %v1285_v12 = vperm.slane %v3312_v32, 3 }
 0x4a5   : > { %v1165_v17 = vperm.slane %v1161_v14, %v3336_v47  ;;  %v1172_v18 = vsel %vm540_vm5, %v1171_v11, %v1152_v13  ;;  %v1191_v20 = vrot.slane %v1170_v15, 4 }
 0x4a6   : > { %v1176_v19 = vperm.slane %v1172_v18, %v3336_v47  ;;  %v2660_v18 = vld [vmem:[%s3925_s5 + $0x10] sm:$0xff] }
 0x4a7   : > { %v1180_v21 = vsel %vm540_vm5, %v1165_v17, %v1179_v16  ;;  %v1177_v22 = vrot.slane %v1165_v17, 4  ;;  %v2661_v17 = vld [vmem:[%s3925_s5 + $0x18] sm:$0xff] }
 0x4a8   : > { %v1188_v23 = vperm.slane %v1180_v21, %v3347_v2  ;;  %v1192_v24 = vsel %vm540_vm5, %v1176_v19, %v1191_v20  ;;  %v1189_v25 = vrot.slane %v1176_v19, 4  ;;  %1372 = vmatpush.bf16.msra.mxu3 %v2661_v17  ;;  %v2659_v19 = vld [vmem:[%s3925_s5 + $0x8] sm:$0xff]  ;;  %v2658_v20 = vld [vmem:[%s3925_s5] sm:$0xff]  ;;  %v1292_v21 = vperm.slane %v3312_v32, 4 }
 0x4a9   : > { %v1200_v46 = vperm.slane %v1192_v24, %v3347_v2  ;;  %v1178_v26 = vsel %vm540_vm5, %v1177_v22, %v1159_v7 }
 0x4aa   : > { %v1207_v27 = vrot.slane %v1188_v23, 4  ;;  %v1184_v28 = vperm.slane %v1178_v26, %v3347_v2  ;;  %v1190_v50 = vsel %vm540_vm5, %v1189_v25, %v1170_v15 }
 0x4ab   : > { %v1205_v29 = vrot.slane %v1200_v46, 4  ;;  %v1196_v31 = vperm.slane %v1190_v50, %v3347_v2 }
 0x4ac   : > { %v1208_v33 = vsel %vm540_vm5, %v1200_v46, %v1207_v27  ;;  %v1203_v34 = vrot.slane %v1184_v28, 4  ;;  %1373 = vmatpush.bf16.msra.mxu3 %v2660_v18 }
 0x4ad   : > { %1218 = vrot.lane.b32.xlu2 %v1208_v33, %s3936_s28  ;;  %v1206_v52 = vsel %vm540_vm5, %v1205_v29, %v1188_v23  ;;  %v1201_v36 = vrot.slane %v1196_v31, 4 }
 0x4ae   : > { %1214 = vrot.lane.b32.xlu1 %v1206_v52, %s3937_s12  ;;  %v1204_v38 = vsel %vm540_vm5, %v1196_v31, %v1203_v34  ;;  %v1339_v52 = vperm.slane %v3312_v32, 5  ;;  %v2662_v32 = vld [vmem:[%s3922_s2 + $0x10] sm:$0xff] }
 0x4af   : > { %1210 = vrot.lane.b32.xlu0 %v1204_v38, %s3935_s17  ;;  %v1202_v37 = vsel %vm540_vm5, %v1201_v36, %v1184_v28 }
 0x4b0   : > { %1374 = vmatpush.bf16.msra.mxu3 %v2659_v19 }
 0x4b4   : > { %1375 = vmatpush.bf16.msra.mxu3 %v2658_v20 }
 0x507   : > { %v1219_v43 = vpop.permute.xlu2 %1218 }
 0x520   : > { %v1215_v40 = vpop.permute.xlu1 %1214 }
 0x521   : > { %v1211_v41 = vpop.permute.xlu0 %1210 }
 0x522   : > { %v1221_v42 = vsel %vm886_vm6, %v1202_v37, %v1211_v41 }
 0x523   : > { %v1223_v44 = vsel %vm1222_vm8, %v1221_v42, %v1215_v40 }
 0x524   : > { %v1225_v45 = vsel %vm1224_vm9, %v1223_v44, %v1219_v43 }
 0x525   : > { %v1226_v48 = vpack.c.bf16 %v1225_v45, %v1225_v45  ;;  %v2663_v45 = vld [vmem:[%s3922_s2 + $0x18] sm:$0xff] }
 0x526   : > { %1438 = vmatpush.bf16.msrb.mxu0 %v2663_v45 }
 0x527   : > { %2542 = vmatmul.msk.bf16.vlgmr.msra.gmra.mxu1 %vm435_vm0, %v1226_v48 }
 0x52a   : > { %1439 = vmatpush.bf16.msrb.mxu0 %v2662_v32 }
 0x5a4   : > { %v1256_v35 = vpop.f32.mrf.mxu1 }
 0x5a5   : > { %v1257_v51 = vadd.f32 %v1256_v35, %v1231_v49 }
 0x5a7   : > { %v1260_v53 = vadd.f32 %v1257_v51, %v3307_v30  ;;  %v2656_v30 = vld [vmem:[%s3924_s4] sm:$0xff] }
 0x5a8   : > { %1315 = vmatpush.bf16.msra.mxu2 %v2656_v30 }
 0x5a9   : > { %v1261_v54 = vsel %vm435_vm0, %v1260_v53, 0.0 }
 0x5aa   : > { %1262 = vadd.xlane.f32.xlu0 %v1261_v54 }
 0x5ac   : > { %v1258_v56 = vpop.f32.mrf.mxu1 }
 0x61d   : > { %v1263_v57 = vpop.xlane.xlu0 %1262 }
 0x61e   : > { %v1264_v58 = vmul.f32 %v1263_v57, %v3296_v8 }
 0x620   : > { %v1265_v59 = vsub.f32 %v1260_v53, %v1264_v58 }
 0x622   : > { %v1266_v60 = vmul.f32 %v1265_v59, %v1265_v59 }
 0x624   : > { %v1267_v61 = vsel %vm435_vm0, %v1266_v60, 0.0 }
 0x625   : > { %1268 = vadd.xlane.f32.xlu1 %v1267_v61 }
 0x698   : > { %v1269_v63 = vpop.xlane.xlu1 %1268 }
 0x699   : > { %v1270_v0 = vmul.f32 %v1269_v63, %v3296_v8 }
 0x69b   : > { %v1271_v1 = vadd.f32 1e-12, %v1270_v0 }
 0x69d   : > { %2800 = vrsqrt.f32 %v1271_v1  ;;  %vm1278_vm11 = vweird.f32 %v1271_v1 }
 0x6a3   : > { %v2801_v3 = vpop.eup %2800 }
 0x6a4   : > { %v1273_v4 = vmul.f32 %v2801_v3, %v1271_v1  ;;  %vm1279_vm10 = vweird.f32 %v2801_v3 }
 0x6a5   : > { %vm1280_vm12 = vmor %vm1278_vm11, %vm1279_vm10 }
 0x6a6   : > { %v1274_v5 = vmul.f32 %v2801_v3, %v1273_v4 }
 0x6a8   : > { %v1275_v6 = vmul.f32 0.5, %v1274_v5 }
 0x6aa   : > { %v1276_v7 = vsub.f32 1.5, %v1275_v6 }
 0x6ac   : > { %v1277_v9 = vmul.f32 %v2801_v3, %v1276_v7 }
 0x6ae   : > { %v1281_v11 = vsel %vm1280_vm12, %v2801_v3, %v1277_v9  ;;  %v3605_v3 = vld [vmem:[#allocation7 + $0x8] sm:$0xff] }
 0x6af   : > { %v1282_v13 = vmul.f32 %v1281_v11, %v1265_v59  ;;  %v2830_v59 = vld [vmem:[#allocation7] sm:$0xff]  ;;  %v1416_v4 = vperm.slane %v3605_v3, 0 }
 0x6b0   : > { %v1404_v60 = vperm.slane %v2830_v59, 6  ;;  %v1406_v62 = vperm.slane %v2830_v59, 7 }
 0x6b1   : > { %v1284_v14 = vmul.f32 %v1283_v10, %v1282_v13 }
 0x6b3   : > { %v1286_v15 = vadd.f32 %v1285_v12, %v1284_v14 }
 0x6b5   : > { %v1287_v16 = vpack.c.bf16 %v1286_v15, %v1286_v15 }
 0x6b7   : > { %2551 = vmatmul.msk.bf16.vlgmr.msra.gmra.mxu2 %vm435_vm0, %v1287_v16 }
 0x73a   : > { %v1317_v22 = vpop.f32.mrf.mxu2 }
 0x73b   : > { %v1318_v23 = vadd.f32 %v1317_v22, %v1292_v21 }
 0x73d   : > { %v1321_v24 = vmul.f32 %v1318_v23, %v1318_v23 }
 0x73f   : > { %v1322_v25 = vmul.f32 %v1321_v24, %v1318_v23 }
 0x741   : > { %v1323_v46 = vmul.f32 0.044715, %v1322_v25 }
 0x742   : > { %v1319_v26 = vpop.f32.mrf.mxu2 }
 0x743   : > { %v1324_v27 = vadd.f32 %v1323_v46, %v1318_v23 }
 0x745   : > { %v1325_v28 = vmul.f32 0.7978846, %v1324_v27 }
 0x747   : > { %2802 = vtanh.f32 %v1325_v28 }
 0x74d   : > { %v2803_v50 = vpop.eup %2802 }
 0x74e   : > { %v1327_v29 = vadd.f32 1.0, %v2803_v50 }
 0x750   : > { %v1328_v31 = vmul.f32 0.5, %v1327_v29 }
 0x752   : > { %v1329_v33 = vmul.f32 %v1328_v31, %v1318_v23 }
 0x754   : > { %v1330_v34 = vpack.c.bf16 %v1329_v33, %v1329_v33 }
 0x756   : > { %2568 = vmatmul.msk.bf16.vlgmr.msra.gmra.mxu3 %vm1364_vm13, %v1330_v34 }
 0x7d9   : > { %v1377_v36 = vpop.f32.mrf.mxu3 }
 0x7da   : > { %v1378_v38 = vadd.f32 %v1377_v36, %v1339_v52 }
 0x7dc   : > { %v1381_v37 = vadd.f32 %v1378_v38, %v1286_v15 }
 0x7de   : > { %v1382_v39 = vsel %vm435_vm0, %v1381_v37, 0.0 }
 0x7df   : > { %1383 = vadd.xlane.f32.xlu2 %v1382_v39 }
 0x7e1   : > { %v1379_v55 = vpop.f32.mrf.mxu3 }
 0x852   : > { %v1384_v40 = vpop.xlane.xlu2 %1383 }
 0x853   : > { %v1385_v41 = vmul.f32 %v1384_v40, %v3296_v8 }
 0x855   : > { %v1386_v42 = vsub.f32 %v1381_v37, %v1385_v41 }
 0x857   : > { %v1387_v43 = vmul.f32 %v1386_v42, %v1386_v42 }
 0x859   : > { %v1388_v44 = vsel %vm435_vm0, %v1387_v43, 0.0 }
 0x85a   : > { %1389 = vadd.xlane.f32.xlu0 %v1388_v44 }
 0x8cd   : > { %v1390_v48 = vpop.xlane.xlu0 %1389 }
 0x8ce   : > { %v1391_v49 = vmul.f32 %v1390_v48, %v3296_v8 }
 0x8d0   : > { %v1392_v35 = vadd.f32 1e-12, %v1391_v49 }
 0x8d2   : > { %2804 = vrsqrt.f32 %v1392_v35  ;;  %vm1399_vm15 = vweird.f32 %v1392_v35 }
 0x8d8   : > { %v2805_v51 = vpop.eup %2804 }
 0x8d9   : > { %v1394_v53 = vmul.f32 %v2805_v51, %v1392_v35  ;;  %vm1400_vm14 = vweird.f32 %v2805_v51 }
 0x8da   : > { %vm1401_vm1 = vmor %vm1399_vm15, %vm1400_vm14 }
 0x8db   : > { %v1395_v54 = vmul.f32 %v2805_v51, %v1394_v53 }
 0x8dd   : > { %v1396_v56 = vmul.f32 0.5, %v1395_v54 }
 0x8df   : > { %v1397_v57 = vsub.f32 1.5, %v1396_v56 }
 0x8e1   : > { %v1398_v58 = vmul.f32 %v2805_v51, %v1397_v57 }
 0x8e3   : > { %v1402_v61 = vsel %vm1401_vm1, %v2805_v51, %v1398_v58 }
 0x8e4   : > { %v1403_v30 = vmul.f32 %v1402_v61, %v1386_v42 }
 0x8e6   : > { %v1405_v63 = vmul.f32 %v1404_v60, %v1403_v30 }
 0x8e8   : > { %v3600_v0 = vadd.f32 %v1406_v62, %v1405_v63 }
 0x8ea   : > { %v1410_v1 = vpack.c.bf16 %v3600_v0, %v3600_v0 }
 0x8ec   : > { %2581 = vmatmul.msk.bf16.vlgmr.msrb.gmra.mxu0 %vm435_vm0, %v1410_v1 }
 0x969   : > { %v1441_v5 = vpop.f32.mrf.mxu0 }
 0x96a   : > { %v3608_v6 = vadd.f32 %v1441_v5, %v1416_v4 }
 0x96c   : > { %1455 = vrot.lane.b32.xlu2 %v3608_v6, %s3071_s25  ;;  %1446 = vrot.lane.b32.xlu0 %v3608_v6, %s3074_s18  ;;  %v1481_v41 = vrot.slane %v3608_v6, 4  ;;  %s3959_s25 = smov 24  }
 0x96d   : > { %1458 = vrot.lane.b32.xlu1 %v3608_v6, %s3072_s26  ;;  %s3960_s26 = smov 8  }
 0x971   : > { %v1443_v7 = vpop.f32.mrf.mxu0 }
 0x974   : > { %1461 = vrot.lane.b32.xlu2 %v3608_v6, %s3076_s20  ;;  %1464 = vrot.lane.b32.xlu0 %v3608_v6, %s3073_s13  ;;  %s430_s13 = scalar_lea.vmem [#allocation11], %s3273_s7  ;;  %s2379_s20 = scalar_lea.sflag [#allocation4], %s3273_s7 }
 0x975   : > { %1452 = vrot.lane.b32.xlu1 %v3608_v6, %s3070_s8  ;;  %s3958_s8 = smov 16   ;;  %s2389_s18 = sshll.u32 %s430_s13, 4  ;;  %s2390_s18 = int_to_ptr.vmem [resolvable:$true] %s2389_s18 }
 0x97c   : > { %1449 = vrot.lane.b32.xlu0 %v3608_v6, %s3075_s14 }
 0x9c6   : > { %v1456_v9 = vpop.permute.xlu2 %1455 }
 0x9c7   : > { %v1505_v13 = vrot.slane %v1456_v9, 4 }
 0x9ce   : > { %v1462_v10 = vpop.permute.xlu2 %1461 }
 0x9cf   : > { %v1503_v14 = vrot.slane %v1462_v10, 4  ;;  %v1506_v15 = vsel %vm540_vm5, %v1462_v10, %v1505_v13 }
 0x9d0   : > { %v1514_v18 = vperm.slane %v1506_v15, %v3336_v47 }
 0x9d1   : > { %v1504_v16 = vsel %vm540_vm5, %v1503_v14, %v1456_v9 }
 0x9d2   : > { %v1510_v24 = vperm.slane %v1504_v16, %v3336_v47  ;;  %v1565_v28 = vrot.slane %v1514_v18, 4 }
 0x9d4   : > { %v1553_v33 = vrot.slane %v1510_v24, 4 }
 0x9de   : > { %v1447_v11 = vpop.permute.xlu0 %1446 }
 0x9df   : > { %v1459_v12 = vpop.permute.xlu1 %1458  ;;  %v1493_v20 = vrot.slane %v1447_v11, 4 }
 0x9e0   : > { %v1517_v17 = vrot.slane %v1459_v12, 4 }
 0x9e6   : > { %v1465_v19 = vpop.permute.xlu0 %1464 }
 0x9e7   : > { %v1515_v21 = vrot.slane %v1465_v19, 4  ;;  %v1518_v22 = vsel %vm540_vm5, %v1465_v19, %v1517_v17  ;;  %v1453_v23 = vpop.permute.xlu1 %1452 }
 0x9e8   : > { %v1526_v25 = vperm.slane %v1518_v22, %v3336_v47  ;;  %v1491_v46 = vrot.slane %v1453_v23, 4  ;;  %v1494_v27 = vsel %vm540_vm5, %v1453_v23, %v1493_v20 }
 0x9e9   : > { %v1516_v26 = vsel %vm540_vm5, %v1515_v21, %v1459_v12  ;;  %v1502_v36 = vperm.slane %v1494_v27, %v3336_v47 }
 0x9ea   : > { %v1522_v50 = vperm.slane %v1516_v26, %v3336_v47  ;;  %v1563_v29 = vrot.slane %v1526_v25, 4  ;;  %v1492_v31 = vsel %vm540_vm5, %v1491_v46, %v1447_v11  ;;  %v1566_v52 = vsel %vm540_vm5, %v1526_v25, %v1565_v28 }
 0x9eb   : > { %v1498_v55 = vperm.slane %v1492_v31, %v3336_v47  ;;  %v1574_v42 = vperm.slane %v1566_v52, %v3347_v2  ;;  %v1539_v45 = vrot.slane %v1502_v36, 4 }
 0x9ec   : > { %v1551_v34 = vrot.slane %v1522_v50, 4  ;;  %v1564_v38 = vsel %vm540_vm5, %v1563_v29, %v1514_v18  ;;  %v1554_v39 = vsel %vm540_vm5, %v1522_v50, %v1553_v33 }
 0x9ed   : > { %v1570_v44 = vperm.slane %v1564_v38, %v3347_v2  ;;  %v1562_v49 = vperm.slane %v1554_v39, %v3347_v2  ;;  %v1527_v53 = vrot.slane %v1498_v55, 4  ;;  %v1587_v56 = vrot.slane %v1574_v42, 4 }
 0x9ee   : > { %v1552_v37 = vsel %vm540_vm5, %v1551_v34, %v1510_v24  ;;  %v1450_v40 = vpop.permute.xlu0 %1449 }
 0x9ef   : > { %v1479_v43 = vrot.slane %v1450_v40, 4  ;;  %v1482_v32 = vsel %vm540_vm5, %v1450_v40, %v1481_v41  ;;  %v1558_v48 = vperm.slane %v1552_v37, %v3347_v2  ;;  %v1583_v59 = vrot.slane %v1570_v44, 4 }
 0x9f0   : > { %v1490_v51 = vperm.slane %v1482_v32, %v3336_v47  ;;  %v1579_v63 = vrot.slane %v1562_v49, 4 }
 0x9f1   : > { %v1480_v35 = vsel %vm540_vm5, %v1479_v43, %v3608_v6  ;;  %v1575_v30 = vrot.slane %v1558_v48, 4 }
 0x9f2   : > { %v1486_v54 = vperm.slane %v1480_v35, %v3336_v47  ;;  %v1540_v57 = vsel %vm540_vm5, %v1539_v45, %v1490_v51  ;;  %v1541_v58 = vrot.slane %v1490_v51, 4 }
 0x9f3   : > { %v1546_v62 = vperm.slane %v1540_v57, %v3347_v2 }
 0x9f4   : > { %v1528_v60 = vsel %vm540_vm5, %v1527_v53, %v1486_v54  ;;  %v1529_v61 = vrot.slane %v1486_v54, 4  ;;  %v1542_v4 = vsel %vm540_vm5, %v1502_v36, %v1541_v58 }
 0x9f5   : > { %v1534_v1 = vperm.slane %v1528_v60, %v3347_v2  ;;  %v1550_v7 = vperm.slane %v1542_v4, %v3347_v2  ;;  %v1584_v9 = vsel %vm540_vm5, %v1583_v59, %v1546_v62  ;;  %v1585_v10 = vrot.slane %v1546_v62, 4 }
 0x9f6   : > { %v1530_v5 = vsel %vm540_vm5, %v1498_v55, %v1529_v61  ;;  %v1673_v14 = vrot.slane %v1584_v9, 4 }
 0x9f7   : > { %v1538_v11 = vperm.slane %v1530_v5, %v3347_v2  ;;  %v1576_v12 = vsel %vm540_vm5, %v1575_v30, %v1534_v1  ;;  %v1577_v13 = vrot.slane %v1534_v1, 4  ;;  %v1586_v15 = vsel %vm540_vm5, %v1570_v44, %v1585_v10 }
 0x9f8   : > { %v1588_v16 = vsel %vm540_vm5, %v1587_v56, %v1550_v7  ;;  %v1589_v17 = vrot.slane %v1550_v7, 4  ;;  %v1649_v18 = vrot.slane %v1576_v12, 4  ;;  %v1685_v50 = vrot.slane %v1586_v15, 4 }
 0x9f9   : > { %v1578_v19 = vsel %vm540_vm5, %v1558_v48, %v1577_v13  ;;  %v1580_v20 = vsel %vm540_vm5, %v1579_v63, %v1538_v11  ;;  %v1581_v21 = vrot.slane %v1538_v11, 4  ;;  %v1671_v22 = vrot.slane %v1588_v16, 4 }
 0x9fa   : > { %v1590_v23 = vsel %vm540_vm5, %v1574_v42, %v1589_v17  ;;  %v1647_v24 = vrot.slane %v1580_v20, 4  ;;  %v1661_v25 = vrot.slane %v1578_v19, 4  ;;  %v1674_v46 = vsel %vm540_vm5, %v1588_v16, %v1673_v14 }
 0x9fb   : > { %v1672_v26 = vsel %vm540_vm5, %v1671_v22, %v1584_v9  ;;  %v1682_v27 = vperm.slane %v1674_v46, %v3336_v47  ;;  %v1683_v28 = vrot.slane %v1590_v23, 4  ;;  %v1582_v33 = vsel %vm540_vm5, %v1562_v49, %v1581_v21 }
 0x9fc   : > { %v1648_v29 = vsel %vm540_vm5, %v1647_v24, %v1576_v12  ;;  %v1678_v31 = vperm.slane %v1672_v26, %v3336_v47  ;;  %v1650_v34 = vsel %vm540_vm5, %v1580_v20, %v1649_v18  ;;  %v1659_v37 = vrot.slane %v1582_v33, 4 }
 0x9fd   : > { %v1654_v52 = vperm.slane %v1648_v29, %v3336_v47  ;;  %v1684_v36 = vsel %vm540_vm5, %v1683_v28, %v1586_v15  ;;  %v1658_v38 = vperm.slane %v1650_v34, %v3336_v47  ;;  %v1662_v40 = vsel %vm540_vm5, %v1582_v33, %v1661_v25 }
 0x9fe   : > { %v1690_v39 = vperm.slane %v1684_v36, %v3336_v47  ;;  %v1721_v55 = vrot.slane %v1678_v31, 4  ;;  %v1686_v41 = vsel %vm540_vm5, %v1590_v23, %v1685_v50  ;;  %v1670_v42 = vperm.slane %v1662_v40, %v3336_v47 }
 0x9ff   : > { %v1694_v43 = vperm.slane %v1686_v41, %v3336_v47  ;;  %v1709_v44 = vrot.slane %v1658_v38, 4  ;;  %v1733_v45 = vrot.slane %v1682_v27, 4  ;;  %v1660_v48 = vsel %vm540_vm5, %v1659_v37, %v1578_v19 }
 0xa00   : > { %v1719_v32 = vrot.slane %v1690_v39, 4  ;;  %v1697_v49 = vrot.slane %v1654_v52, 4  ;;  %v1722_v35 = vsel %vm540_vm5, %v1690_v39, %v1721_v55  ;;  %v1707_v54 = vrot.slane %v1670_v42, 4 }
 0xa01   : > { %v1710_v51 = vsel %vm540_vm5, %v1670_v42, %v1709_v44  ;;  %v1734_v53 = vsel %vm540_vm5, %v1694_v43, %v1733_v45  ;;  %v1731_v56 = vrot.slane %v1694_v43, 4  ;;  %v1666_v59 = vperm.slane %v1660_v48, %v3336_v47  ;;  %v2831_v43 = vld [vmem:[%s377_s29] ss:$0 sm:$0xff]  ;;  %s3957_s29 = smov 48  }
 0xa02   : > { %v1718_v57 = vperm.slane %v1710_v51, %v3347_v2  ;;  %v1742_v58 = vperm.slane %v1734_v53, %v3347_v2  ;;  %v1708_v60 = vsel %vm540_vm5, %v1707_v54, %v1658_v38  ;;  %v1730_v62 = vperm.slane %v1722_v35, %v3347_v2 }
 0xa03   : > { %v1732_v61 = vsel %vm540_vm5, %v1731_v56, %v1682_v27  ;;  %v1720_v30 = vsel %vm540_vm5, %v1719_v32, %v1678_v31  ;;  %v1714_v1 = vperm.slane %v1708_v60, %v3347_v2  ;;  %v1698_v7 = vsel %vm540_vm5, %v1666_v59, %v1697_v49 }
 0xa04   : > { %v1755_v63 = vrot.slane %v1742_v58, 4  ;;  %v1738_v4 = vperm.slane %v1732_v61, %v3347_v2  ;;  %v1757_v5 = vrot.slane %v1718_v57, 4  ;;  %v1695_v9 = vrot.slane %v1666_v59, 4 }
 0xa05   : > { %v1726_v10 = vperm.slane %v1720_v30, %v3347_v2  ;;  %v1753_v14 = vrot.slane %v1714_v1, 4  ;;  %v1706_v17 = vperm.slane %v1698_v7, %v3347_v2  ;;  %v1747_v21 = vrot.slane %v1730_v62, 4 }
 0xa06   : > { %v1756_v11 = vsel %vm540_vm5, %v1755_v63, %v1718_v57  ;;  %v1751_v12 = vrot.slane %v1738_v4, 4  ;;  %v1758_v13 = vsel %vm540_vm5, %v1742_v58, %v1757_v5  ;;  %v1696_v18 = vsel %vm540_vm5, %v1695_v9, %v1654_v52 }
 0xa07   : > { %v1819_v15 = vpack.c.bf16 %v1756_v11, %v1756_v11  ;;  %v1820_v16 = vpack.c.bf16 %v1758_v13, %v1758_v13  ;;  %v1754_v20 = vsel %vm540_vm5, %v1738_v4, %v1753_v14  ;;  %v1702_v22 = vperm.slane %v1696_v18, %v3347_v2 }
 0xa08   : > { %v1752_v19 = vsel %vm540_vm5, %v1751_v12, %v1714_v1  ;;  %v1818_v46 = vpack.c.bf16 %v1754_v20, %v1754_v20  ;;  %v1743_v26 = vrot.slane %v1726_v10, 4  ;;  %v1749_v27 = vrot.slane %v1706_v17, 4 }
 0xa09   : > { %v1867_v23 = vsel %vm886_vm6, %v1819_v15, 0  ;;  %v1817_v24 = vpack.c.bf16 %v1752_v19, %v1752_v19  ;;  %v1886_v25 = vsel %vm886_vm6, %v1820_v16, 0  ;;  %v1745_v28 = vrot.slane %v1702_v22, 4 }
 0xa0a   : > { %1876 = vmatpush.bf16.xpose.msrb.mxu3 %v1867_v23  ;;  %1895 = vmatpush.bf16.xpose.msra.mxu0 %v1886_v25  ;;  %v1848_v29 = vsel %vm886_vm6, %v1818_v46, 0  ;;  %v1748_v31 = vsel %vm540_vm5, %v1747_v21, %v1706_v17  ;;  %v1750_v33 = vsel %vm540_vm5, %v1730_v62, %v1749_v27  ;;  %v1744_v34 = vsel %vm540_vm5, %v1743_v26, %v1702_v22 }
 0xa0b   : > { %v1829_v50 = vsel %vm886_vm6, %v1817_v24, 0  ;;  %1857 = vmatpush.bf16.xpose.msrb.mxu2 %v1848_v29  ;;  %v1746_v52 = vsel %vm540_vm5, %v1726_v10, %v1745_v28  ;;  %v1815_v36 = vpack.c.bf16 %v1748_v31, %v1748_v31  ;;  %v1816_v38 = vpack.c.bf16 %v1750_v33, %v1750_v33 }
 0xa0c   : > { %1838 = vmatpush.bf16.xpose.msrb.mxu1 %v1829_v50  ;;  %v1813_v37 = vpack.c.bf16 %v1744_v34, %v1744_v34  ;;  %v1814_v39 = vpack.c.bf16 %v1746_v52, %v1746_v52 }
 0xa11   : > { %2584 = vmatmul.msk.bf16.vlgmr.msrb.gmra.mxu3 %vm886_vm6, %v1815_v36  ;;  %2585 = vmatmul.msk.bf16.vlgmr.msra.gmra.mxu0 %vm886_vm6, %v1816_v38 }
 0xa12   : > { %2583 = vmatmul.msk.bf16.vlgmr.msrb.gmra.mxu2 %vm886_vm6, %v1814_v39 }
 0xa13   : > { %2582 = vmatmul.msk.bf16.vlgmr.msrb.gmra.mxu1 %vm886_vm6, %v1813_v37 }
 0xa8e   : > { %v1897_v55 = vpop.f32.mrf.mxu0 }
 0xa8f   : > { %v1904_v40 = vmul.f32 0.35355338, %v1897_v55 }
 0xa90   : > { %v1840_v41 = vpop.f32.mrf.mxu1 }
 0xa91   : > { %v1901_v42 = vmul.f32 0.35355338, %v1840_v41  ;;  %v1908_v44 = vadd.f32 %v2831_v43, %v1904_v40 }
 0xa93   : > { %v1918_v45 = vsel %vm886_vm6, %v1908_v44, -inf  ;;  %v1905_v32 = vadd.f32 %v2831_v43, %v1901_v42 }
 0xa94   : > { %v1878_v48 = vpop.f32.mrf.mxu3  ;;  %1919 = vmax.xlane.f32.xlu1 %v1918_v45 }
 0xa95   : > { %v1903_v49 = vmul.f32 0.35355338, %v1878_v48  ;;  %v1909_v35 = vsel %vm886_vm6, %v1905_v32, -inf  ;;  %v1859_v51 = vpop.f32.mrf.mxu2 }
 0xa96   : > { %1910 = vmax.xlane.f32.xlu0 %v1909_v35  ;;  %v1899_v53 = vpop.f32.mrf.mxu0  ;;  %v1902_v54 = vmul.f32 0.35355338, %v1859_v51 }
 0xa97   : > { %v1907_v56 = vadd.f32 %v2831_v43, %v1903_v49 }
 0xa98   : > { %v1842_v57 = vpop.f32.mrf.mxu1  ;;  %v1906_v58 = vadd.f32 %v2831_v43, %v1902_v54 }
 0xa99   : > { %v1915_v59 = vsel %vm886_vm6, %v1907_v56, -inf }
 0xa9a   : > { %v1912_v60 = vsel %vm886_vm6, %v1906_v58, -inf }
 0xa9b   : > { %1913 = vmax.xlane.f32.xlu2 %v1912_v60 }
 0xa9c   : > { %v1880_v61 = vpop.f32.mrf.mxu3  ;;  %1916 = vmax.xlane.f32.xlu1 %v1915_v59 }
 0xa9d   : > { %v1861_v62 = vpop.f32.mrf.mxu2 }
 0xaaa   : > { %1470 = vrot.lane.b32.xlu0 %v3608_v6, %s3082_s19 }
 0xab2   : > { %1476 = vrot.lane.b32.xlu0 %v3608_v6, %s3081_s11 }
 0xab3   : > { %1467 = vrot.lane.b32.xlu2 %v3608_v6, %s3077_s21 }
 0xab5   : > { %1473 = vrot.lane.b32.xlu1 %v3608_v6, %s3957_s29 }
 0xb07   : > { %v1920_v30 = vpop.xlane.xlu1 %1919 }
 0xb08   : > { %v1924_v11 = vsub.f32 %v1908_v44, %v1920_v30 }
 0xb09   : > { %v1911_v63 = vpop.xlane.xlu0 %1910 }
 0xb0a   : > { %v1921_v1 = vsub.f32 %v1905_v32, %v1911_v63  ;;  %v1931_v6 = vmul.f32 1.442695, %v1924_v11 }
 0xb0c   : > { %v1925_v4 = vmul.f32 1.442695, %v1921_v1 }
 0xb0e   : > { %2806 = vpow2.f32 %v1925_v4  ;;  %v1914_v7 = vpop.xlane.xlu2 %1913 }
 0xb0f   : > { %v1917_v5 = vpop.xlane.xlu1 %1916  ;;  %v1922_v10 = vsub.f32 %v1906_v58, %v1914_v7 }
 0xb10   : > { %v1923_v9 = vsub.f32 %v1907_v56, %v1917_v5 }
 0xb11   : > { %v1927_v13 = vmul.f32 1.442695, %v1922_v10 }
 0xb12   : > { %v1929_v12 = vmul.f32 1.442695, %v1923_v9 }
 0xb14   : > { %v3728_v14 = vpop.eup %2806  ;;  %2808 = vpow2.f32 %v1929_v12 }
 0xb15   : > { %2810 = vpow2.f32 %v1927_v13  ;;  %v1933_v15 = vsel %vm886_vm6, %v3728_v14, 0.0 }
 0xb16   : > { %1934 = vadd.xlane.f32.xlu1 %v1933_v15  ;;  %2812 = vpow2.f32 %v1931_v6  ;;  %v1468_v22 = vpop.permute.xlu2 %1467 }
 0xb17   : > { %v1593_v27 = vrot.slane %v1468_v22, 4 }
 0xb1a   : > { %v3732_v16 = vpop.eup %2808 }
 0xb1b   : > { %v3734_v17 = vpop.eup %2810  ;;  %v1939_v18 = vsel %vm886_vm6, %v3732_v16, 0.0 }
 0xb1c   : > { %v1471_v19 = vpop.permute.xlu0 %1470  ;;  %1940 = vadd.xlane.f32.xlu2 %v1939_v18  ;;  %v1936_v20 = vsel %vm886_vm6, %v3734_v17, 0.0  ;;  %v3740_v21 = vpop.eup %2812 }
 0xb1d   : > { %1937 = vadd.xlane.f32.xlu0 %v1936_v20  ;;  %v1605_v23 = vrot.slane %v1471_v19, 4  ;;  %v1942_v24 = vsel %vm886_vm6, %v3740_v21, 0.0 }
 0xb24   : > { %v1477_v25 = vpop.permute.xlu0 %1476  ;;  %1943 = vadd.xlane.f32.xlu2 %v1942_v24 }
 0xb25   : > { %v1603_v46 = vrot.slane %v1477_v25, 4  ;;  %v1606_v26 = vsel %vm540_vm5, %v1477_v25, %v1605_v23 }
 0xb26   : > { %v1614_v28 = vperm.slane %v1606_v26, %v3336_v47 }
 0xb27   : > { %v1604_v50 = vsel %vm540_vm5, %v1603_v46, %v1471_v19  ;;  %v1474_v29 = vpop.permute.xlu1 %1473 }
 0xb28   : > { %v1610_v31 = vperm.slane %v1604_v50, %v3336_v47  ;;  %v1591_v33 = vrot.slane %v1474_v29, 4  ;;  %v1594_v34 = vsel %vm540_vm5, %v1474_v29, %v1593_v27  ;;  %v1627_v52 = vrot.slane %v1614_v28, 4 }
 0xb29   : > { %v1602_v36 = vperm.slane %v1594_v34, %v3336_v47 }
 0xb2a   : > { %v1592_v38 = vsel %vm540_vm5, %v1591_v33, %v1468_v22  ;;  %v1615_v37 = vrot.slane %v1610_v31, 4 }
 0xb2b   : > { %v1598_v39 = vperm.slane %v1592_v38, %v3336_v47  ;;  %v1628_v55 = vsel %vm540_vm5, %v1627_v52, %v1602_v36  ;;  %v1629_v40 = vrot.slane %v1602_v36, 4 }
 0xb2c   : > { %v1634_v41 = vperm.slane %v1628_v55, %v3347_v2 }
 0xb2d   : > { %v1616_v42 = vsel %vm540_vm5, %v1615_v37, %v1598_v39  ;;  %v1617_v43 = vrot.slane %v1598_v39, 4  ;;  %v1630_v44 = vsel %vm540_vm5, %v1614_v28, %v1629_v40 }
 0xb2e   : > { %v1622_v45 = vperm.slane %v1616_v42, %v3347_v2  ;;  %v1638_v32 = vperm.slane %v1630_v44, %v3347_v2  ;;  %v1643_v35 = vrot.slane %v1634_v41, 4 }
 0xb2f   : > { %v1618_v48 = vsel %vm540_vm5, %v1610_v31, %v1617_v43 }
 0xb30   : > { %v1626_v49 = vperm.slane %v1618_v48, %v3347_v2  ;;  %v1645_v51 = vrot.slane %v1638_v32, 4  ;;  %v1639_v53 = vrot.slane %v1622_v45, 4  ;;  %v1644_v61 = vsel %vm540_vm5, 0.0, %v1643_v35 }
 0xb32   : > { %v1641_v54 = vrot.slane %v1626_v49, 4  ;;  %v1646_v56 = vsel %vm540_vm5, 0.0, %v1645_v51  ;;  %v1770_v57 = vsel %vm540_vm5, %v1645_v51, %v1634_v41  ;;  %v1640_v5 = vsel %vm540_vm5, 0.0, %v1639_v53 }
 0xb33   : > { %v1774_v58 = vperm.slane %v1770_v57, %v3336_v47  ;;  %v1775_v59 = vrot.slane %v1646_v56, 4 }
 0xb34   : > { %v1642_v60 = vsel %vm540_vm5, 0.0, %v1641_v54  ;;  %v1759_v62 = vsel %vm540_vm5, %v1641_v54, %v1622_v45 }
 0xb35   : > { %v1764_v30 = vrot.slane %v1642_v60, 4  ;;  %v1776_v63 = vsel %vm540_vm5, %v1775_v59, %v1644_v61  ;;  %v1795_v1 = vrot.slane %v1774_v58, 4  ;;  %v1763_v4 = vperm.slane %v1759_v62, %v3336_v47 }
 0xb36   : > { %v1780_v7 = vperm.slane %v1776_v63, %v3336_v47 }
 0xb37   : > { %v1765_v9 = vsel %vm540_vm5, %v1764_v30, %v1640_v5  ;;  %v1783_v10 = vrot.slane %v1763_v4, 4 }
 0xb38   : > { %v1793_v11 = vrot.slane %v1780_v7, 4  ;;  %v1769_v12 = vperm.slane %v1765_v9, %v3336_v47  ;;  %v1796_v13 = vsel %vm540_vm5, %v1780_v7, %v1795_v1 }
 0xb39   : > { %v1804_v15 = vperm.slane %v1796_v13, %v3347_v2 }
 0xb3a   : > { %v1784_v6 = vsel %vm540_vm5, %v1769_v12, %v1783_v10  ;;  %v1781_v18 = vrot.slane %v1769_v12, 4  ;;  %v1794_v19 = vsel %vm540_vm5, %v1793_v11, %v1774_v58 }
 0xb3b   : > { %v1792_v20 = vperm.slane %v1784_v6, %v3347_v2  ;;  %v1809_v22 = vrot.slane %v1804_v15, 4  ;;  %v1800_v23 = vperm.slane %v1794_v19, %v3347_v2 }
 0xb3c   : > { %v1782_v24 = vsel %vm540_vm5, %v1781_v18, %v1763_v4 }
 0xb3d   : > { %v1810_v25 = vsel %vm540_vm5, %v1809_v22, %v1792_v20  ;;  %v1788_v46 = vperm.slane %v1782_v24, %v3347_v2  ;;  %v1805_v26 = vrot.slane %v1800_v23, 4  ;;  %v1811_v27 = vrot.slane %v1792_v20, 4 }
 0xb3e   : > { %v1823_v28 = vpack.c.bf16 %v1810_v25, %v1810_v25 }
 0xb3f   : > { %v1806_v50 = vsel %vm540_vm5, %v1805_v26, %v1788_v46  ;;  %v1812_v29 = vsel %vm540_vm5, %v1804_v15, %v1811_v27  ;;  %v1807_v31 = vrot.slane %v1788_v46, 4 }
 0xb40   : > { %v1999_v33 = vsel %vm1025_vm7, %v1823_v28, 0  ;;  %v1821_v34 = vpack.c.bf16 %v1806_v50, %v1806_v50  ;;  %v1824_v52 = vpack.c.bf16 %v1812_v29, %v1812_v29 }
 0xb41   : > { %2008 = vmatpush.bf16.msra.mxu3 %v1999_v33  ;;  %v1808_v36 = vsel %vm540_vm5, %v1800_v23, %v1807_v31 }
 0xb42   : > { %v1961_v38 = vsel %vm1025_vm7, %v1821_v34, 0  ;;  %v2018_v37 = vsel %vm1025_vm7, %v1824_v52, 0  ;;  %v1822_v39 = vpack.c.bf16 %v1808_v36, %v1808_v36 }
 0xb43   : > { %1970 = vmatpush.bf16.msra.mxu1 %v1961_v38  ;;  %2027 = vmatpush.bf16.msrb.mxu0 %v2018_v37 }
 0xb44   : > { %v1980_v55 = vsel %vm1025_vm7, %v1822_v39, 0 }
 0xb45   : > { %1989 = vmatpush.bf16.msra.mxu2 %v1980_v55 }
 0xb89   : > { %v1935_v40 = vpop.xlane.xlu1 %1934 }
 0xb8a   : > { %2814 = vrcp.f32 %v1935_v40 }
 0xb8f   : > { %v1941_v41 = vpop.xlane.xlu2 %1940 }
 0xb90   : > { %v2815_v42 = vpop.eup %2814  ;;  %2816 = vrcp.f32 %v1941_v41  ;;  %v1938_v43 = vpop.xlane.xlu0 %1937 }
 0xb91   : > { %v1949_v44 = vmul.f32 %v2815_v42, %v3728_v14  ;;  %2818 = vrcp.f32 %v1938_v43 }
 0xb93   : > { %v1953_v45 = vpack.c.bf16 %v1949_v44, %v1949_v44 }
 0xb95   : > { %2586 = vmatmul.msk.bf16.vlgmr.msra.gmra.mxu1 %vm886_vm6, %v1953_v45 }
 0xb96   : > { %v2817_v32 = vpop.eup %2816 }
 0xb97   : > { %v2819_v48 = vpop.eup %2818  ;;  %v1951_v49 = vmul.f32 %v2817_v32, %v3732_v16  ;;  %v1944_v35 = vpop.xlane.xlu2 %1943 }
 0xb98   : > { %v1950_v51 = vmul.f32 %v2819_v48, %v3734_v17  ;;  %2820 = vrcp.f32 %v1944_v35 }
 0xb99   : > { %v1955_v53 = vpack.c.bf16 %v1951_v49, %v1951_v49 }
 0xb9a   : > { %v1954_v54 = vpack.c.bf16 %v1950_v51, %v1950_v51 }
 0xb9b   : > { %2588 = vmatmul.msk.bf16.vlgmr.msra.gmra.mxu3 %vm886_vm6, %v1955_v53 }
 0xb9c   : > { %2587 = vmatmul.msk.bf16.vlgmr.msra.gmra.mxu2 %vm886_vm6, %v1954_v54 }
 0xb9e   : > { %v2821_v56 = vpop.eup %2820 }
 0xb9f   : > { %v1952_v14 = vmul.f32 %v2821_v56, %v3740_v21 }
 0xba1   : > { %v1956_v57 = vpack.c.bf16 %v1952_v14, %v1952_v14 }
 0xba3   : > { %2589 = vmatmul.msk.bf16.vlgmr.msrb.gmra.mxu0 %vm886_vm6, %v1956_v57 }
 0xc12   : > { %v1972_v58 = vpop.f32.mrf.mxu1 }
 0xc13   : > { %v2035_v60 = vrot.slane %v1972_v58, 4 }
 0xc1a   : > { %v1974_v59 = vpop.f32.mrf.mxu1 }
 0xc1e   : > { %v2010_v16 = vpop.f32.mrf.mxu3 }
 0xc1f   : > { %v1991_v61 = vpop.f32.mrf.mxu2  ;;  %v2033_v62 = vrot.slane %v2010_v16, 4  ;;  %v2036_v17 = vsel %vm540_vm5, %v2010_v16, %v2035_v60 }
 0xc20   : > { %v2047_v30 = vrot.slane %v1991_v61, 4  ;;  %v2044_v63 = vperm.slane %v2036_v17, %v3336_v47  ;;  %v2029_v1 = vpop.f32.mrf.mxu0 }
 0xc21   : > { %v2034_v4 = vsel %vm540_vm5, %v2033_v62, %v1972_v58  ;;  %v2045_v5 = vrot.slane %v2029_v1, 4 }
 0xc22   : > { %v2040_v21 = vperm.slane %v2034_v4, %v3336_v47  ;;  %v2071_v7 = vrot.slane %v2044_v63, 4  ;;  %v2048_v9 = vsel %vm540_vm5, %v2029_v1, %v2047_v30  ;;  %v2664_v4 = vld [vmem:[%s3923_s3 + $0x10] sm:$0xff] }
 0xc23   : > { %v2046_v10 = vsel %vm540_vm5, %v2045_v5, %v1991_v61  ;;  %v2056_v11 = vperm.slane %v2048_v9, %v3336_v47 }
 0xc24   : > { %v2059_v12 = vrot.slane %v2040_v21, 4  ;;  %v2052_v13 = vperm.slane %v2046_v10, %v3336_v47 }
 0xc25   : > { %v2069_v15 = vrot.slane %v2056_v11, 4  ;;  %v2072_v6 = vsel %vm540_vm5, %v2056_v11, %v2071_v7 }
 0xc26   : > { %v2057_v18 = vrot.slane %v2052_v13, 4  ;;  %v2060_v19 = vsel %vm540_vm5, %v2052_v13, %v2059_v12  ;;  %v2080_v20 = vperm.slane %v2072_v6, %v3347_v2  ;;  %v2012_v22 = vpop.f32.mrf.mxu3  ;;  %v2164_v13 = vperm.slane %v3605_v3, 1 }
 0xc27   : > { %v2068_v23 = vperm.slane %v2060_v19, %v3347_v2  ;;  %v2070_v24 = vsel %vm540_vm5, %v2069_v15, %v2044_v63  ;;  %v1993_v25 = vpop.f32.mrf.mxu2 }
 0xc28   : > { %v2058_v46 = vsel %vm540_vm5, %v2057_v18, %v2040_v21  ;;  %v2076_v26 = vperm.slane %v2070_v24, %v3347_v2  ;;  %v2087_v27 = vrot.slane %v2080_v20, 4  ;;  %v2031_v28 = vpop.f32.mrf.mxu0 }
 0xc29   : > { %v2064_v50 = vperm.slane %v2058_v46, %v3347_v2  ;;  %v2083_v29 = vrot.slane %v2068_v23, 4 }
 0xc2a   : > { %v2085_v31 = vrot.slane %v2076_v26, 4  ;;  %v2088_v33 = vsel %vm540_vm5, 0.0, %v2087_v27  ;;  %v2100_v34 = vsel %vm540_vm5, %v2087_v27, %v2076_v26  ;;  %v2667_v26 = vld [vmem:[%s3924_s4 + $0x18] sm:$0xff] }
 0xc2b   : > { %v2081_v52 = vrot.slane %v2064_v50, 4  ;;  %v2084_v36 = vsel %vm540_vm5, 0.0, %v2083_v29  ;;  %v2104_v38 = vperm.slane %v2100_v34, %v3336_v47  ;;  %v2105_v37 = vrot.slane %v2088_v33, 4  ;;  %2248 = vmatpush.bf16.msrb.mxu2 %v2667_v26 }
 0xc2c   : > { %v2086_v39 = vsel %vm540_vm5, 0.0, %v2085_v31  ;;  %v2094_v55 = vrot.slane %v2084_v36, 4  ;;  %v2089_v40 = vsel %vm540_vm5, %v2083_v29, %v2064_v50 }
 0xc2d   : > { %v2082_v41 = vsel %vm540_vm5, 0.0, %v2081_v52  ;;  %v2093_v42 = vperm.slane %v2089_v40, %v3336_v47  ;;  %v2106_v43 = vsel %vm540_vm5, %v2105_v37, %v2086_v39  ;;  %v2125_v44 = vrot.slane %v2104_v38, 4 }
 0xc2e   : > { %v2095_v45 = vsel %vm540_vm5, %v2094_v55, %v2082_v41  ;;  %v2110_v32 = vperm.slane %v2106_v43, %v3336_v47  ;;  %v2218_v39 = vperm.slane %v3605_v3, 3  ;;  %v2671_v43 = vld [vmem:[%s3925_s5 + $0x38] sm:$0xff] }
 0xc2f   : > { %v2099_v48 = vperm.slane %v2095_v45, %v3336_v47  ;;  %v2113_v49 = vrot.slane %v2093_v42, 4  ;;  %2306 = vmatpush.bf16.msrb.mxu3 %v2671_v43  ;;  %v2669_v45 = vld [vmem:[%s3925_s5 + $0x28] sm:$0xff] }
 0xc30   : > { %v2126_v35 = vsel %vm540_vm5, %v2110_v32, %v2125_v44  ;;  %v2123_v51 = vrot.slane %v2110_v32, 4  ;;  %v2670_v44 = vld [vmem:[%s3925_s5 + $0x30] sm:$0xff]  ;;  %v2668_v32 = vld [vmem:[%s3925_s5 + $0x20] sm:$0xff] }
 0xc31   : > { %v2114_v53 = vsel %vm540_vm5, %v2099_v48, %v2113_v49  ;;  %v2134_v54 = vperm.slane %v2126_v35, %v3347_v2  ;;  %v2111_v56 = vrot.slane %v2099_v48, 4  ;;  %v2226_v48 = vperm.slane %v3605_v3, 4 }
 0xc32   : > { %v2122_v14 = vperm.slane %v2114_v53, %v3347_v2  ;;  %v2124_v57 = vsel %vm540_vm5, %v2123_v51, %v2104_v38  ;;  %v2216_v38 = vperm.slane %v3605_v3, 2 }
 0xc33   : > { %v2139_v58 = vrot.slane %v2134_v54, 4  ;;  %v2112_v59 = vsel %vm540_vm5, %v2111_v56, %v2093_v42  ;;  %v2130_v60 = vperm.slane %v2124_v57, %v3347_v2  ;;  %2307 = vmatpush.bf16.msrb.mxu3 %v2670_v44 }
 0xc34   : > { %v2141_v16 = vrot.slane %v2122_v14, 4  ;;  %v2118_v47 = vperm.slane %v2112_v59, %v3347_v2  ;;  %v2665_v2 = vld [vmem:[%s3923_s3 + $0x18] sm:$0xff] }
 0xc35   : > { %v2140_v61 = vsel %vm540_vm5, %v2139_v58, %v2122_v14  ;;  %v2135_v62 = vrot.slane %v2130_v60, 4  ;;  %2186 = vmatpush.bf16.msrb.mxu1 %v2665_v2 }
 0xc36   : > { %2148 = vrot.lane.b32.xlu0 %v2140_v61, %s3958_s8  ;;  %v2142_v17 = vsel %vm540_vm5, %v2134_v54, %v2141_v16  ;;  %v2137_v30 = vrot.slane %v2118_v47, 4  ;;  %v2274_v61 = vperm.slane %v3605_v3, 5 }
 0xc37   : > { %2152 = vrot.lane.b32.xlu1 %v2142_v17, %s3959_s25  ;;  %v2136_v63 = vsel %vm540_vm5, %v2135_v62, %v2118_v47  ;;  %2308 = vmatpush.bf16.msrb.mxu3 %v2669_v45 }
 0xc38   : > { %v2138_v1 = vsel %vm540_vm5, %v2130_v60, %v2137_v30 }
 0xc39   : > { %2144 = vrot.lane.b32.xlu2 %v2138_v1, %s3960_s26  ;;  %2187 = vmatpush.bf16.msrb.mxu1 %v2664_v4  ;;  %s2387_s26 = scalar_lea.hbm %s3929_s9, %s3160_s16  ;;  %s3002_s16 = scalar_lea.hbm %s3929_s9, 2 }
 0xc3a   : > { %s2391_s14 = sshll.u32 %s2387_s26, 4  ;;  %s2392_s14 = int_to_ptr.hbm [resolvable:$true] %s2391_s14 }
 0xc3b   : > { %2309 = vmatpush.bf16.msrb.mxu3 %v2668_v32  ;;  %s2996_s21 = sshra.s32 %s2392_s14, 4  ;;  %s2997_s21 = int_to_ptr.hbm [resolvable:$true] %s2996_s21 }
 0xc3c   : > { %s2998_s11 = scalar_lea.hbm %s2997_s21, 1  ;;  %p3003_p7 = scmp.lt.s32.totalorder %s2997_s21, %s3929_s9 }
 0xc3d   : > { %p2999_p1 = scmp.ne.s32.totalorder %s2997_s21, %s2998_s11  ;;  %p3004_p9 = scmp.lt.s32.totalorder %s3002_s16, %s2998_s11 }
 0xc3f   : > { %p3000_p3 = pnand %p2999_p1, %p3216_p0  ;;  %p3005_p8 = por %p3004_p9, %p3003_p7 }
 0xc41   : > { %p3001_p13 = pneg %p3000_p3 }
 0xc43   : > { %p3006_p10 = pnand %p3005_p8, %p3001_p13 }
 0xc93   : > { %v2145_v5 = vpop.permute.xlu2 %2144 }
 0xc94   : > { %v2155_v21 = vsel %vm886_vm6, %v2136_v63, %v2145_v5 }
 0xca8   : > { %v2149_v7 = vpop.permute.xlu0 %2148 }
 0xca9   : > { %v2156_v9 = vsel %vm1222_vm8, %v2155_v21, %v2149_v7  ;;  %v2153_v10 = vpop.permute.xlu1 %2152 }
 0xcaa   : > { %v2157_v11 = vsel %vm1224_vm9, %v2156_v9, %v2153_v10  ;;  %v2673_v9 = vld [vmem:[#allocation8 + $0x8] sm:$0xff]  ;;  %v2672_v10 = vld [vmem:[#allocation8] sm:$0xff] }
 0xcab   : > { %v2158_v12 = vpack.c.bf16 %v2157_v11, %v2157_v11  ;;  %2369 = vmatpush.bf16.msra.mxu0 %v2673_v9 }
 0xcad   : > { %2602 = vmatmul.msk.bf16.vlgmr.msrb.gmra.mxu1 %vm435_vm0, %v2158_v12 }
 0xcaf   : > { %2370 = vmatpush.bf16.msra.mxu0 %v2672_v10 }
 0xd2a   : > { %v2189_v15 = vpop.f32.mrf.mxu1 }
 0xd2b   : > { %v2190_v6 = vadd.f32 %v2189_v15, %v2164_v13 }
 0xd2d   : > { %v2193_v18 = vadd.f32 %v2190_v6, %v3600_v0  ;;  %v2666_v0 = vld [vmem:[%s3924_s4 + $0x10] sm:$0xff] }
 0xd2e   : > { %2249 = vmatpush.bf16.msrb.mxu2 %v2666_v0 }
 0xd2f   : > { %v2194_v19 = vsel %vm435_vm0, %v2193_v18, 0.0 }
 0xd30   : > { %2195 = vadd.xlane.f32.xlu0 %v2194_v19 }
 0xd32   : > { %v2191_v20 = vpop.f32.mrf.mxu1 }
 0xda3   : > { %v2196_v22 = vpop.xlane.xlu0 %2195 }
 0xda4   : > { %v2197_v23 = vmul.f32 %v2196_v22, %v3296_v8 }
 0xda6   : > { %v2198_v24 = vsub.f32 %v2193_v18, %v2197_v23  ;;  %v2338_v23 = vperm.slane %v3605_v3, 6 }
 0xda8   : > { %v2199_v25 = vmul.f32 %v2198_v24, %v2198_v24 }
 0xdaa   : > { %v2200_v46 = vsel %vm435_vm0, %v2199_v25, 0.0 }
 0xdab   : > { %2201 = vadd.xlane.f32.xlu2 %v2200_v46  ;;  %v2340_v46 = vperm.slane %v3605_v3, 7 }
 0xe1e   : > { %v2202_v27 = vpop.xlane.xlu2 %2201 }
 0xe1f   : > { %v2203_v28 = vmul.f32 %v2202_v27, %v3296_v8  ;;  %v2347_v27 = vld [vmem:[#allocation10] sm:$0x1] }
 0xe21   : > { %v2204_v50 = vadd.f32 1e-12, %v2203_v28 }
 0xe23   : > { %2822 = vrsqrt.f32 %v2204_v50  ;;  %vm2211_vm3 = vweird.f32 %v2204_v50 }
 0xe29   : > { %v2823_v29 = vpop.eup %2822 }
 0xe2a   : > { %v2206_v31 = vmul.f32 %v2823_v29, %v2204_v50  ;;  %vm2212_vm2 = vweird.f32 %v2823_v29 }
 0xe2b   : > { %vm2213_vm4 = vmor %vm2211_vm3, %vm2212_vm2 }
 0xe2c   : > { %v2207_v33 = vmul.f32 %v2823_v29, %v2206_v31 }
 0xe2e   : > { %v2208_v34 = vmul.f32 0.5, %v2207_v33 }
 0xe30   : > { %v2209_v52 = vsub.f32 1.5, %v2208_v34 }
 0xe32   : > { %v2210_v36 = vmul.f32 %v2823_v29, %v2209_v52 }
 0xe34   : > { %v2214_v37 = vsel %vm2213_vm4, %v2823_v29, %v2210_v36 }
 0xe35   : > { %v2215_v55 = vmul.f32 %v2214_v37, %v2198_v24 }
 0xe37   : > { %v2217_v40 = vmul.f32 %v2216_v38, %v2215_v55 }
 0xe39   : > { %v2219_v41 = vadd.f32 %v2218_v39, %v2217_v40 }
 0xe3b   : > { %v2220_v42 = vpack.c.bf16 %v2219_v41, %v2219_v41 }
 0xe3d   : > { %2615 = vmatmul.msk.bf16.vlgmr.msrb.gmra.mxu2 %vm435_vm0, %v2220_v42 }
 0xec0   : > { %v2251_v49 = vpop.f32.mrf.mxu2 }
 0xec1   : > { %v2252_v35 = vadd.f32 %v2251_v49, %v2226_v48 }
 0xec3   : > { %v2255_v51 = vmul.f32 %v2252_v35, %v2252_v35 }
 0xec5   : > { %v2256_v53 = vmul.f32 %v2255_v51, %v2252_v35 }
 0xec7   : > { %v2257_v54 = vmul.f32 0.044715, %v2256_v53 }
 0xec8   : > { %v2253_v56 = vpop.f32.mrf.mxu2 }
 0xec9   : > { %v2258_v14 = vadd.f32 %v2257_v54, %v2252_v35 }
 0xecb   : > { %v2259_v57 = vmul.f32 0.7978846, %v2258_v14 }
 0xecd   : > { %2824 = vtanh.f32 %v2259_v57 }
 0xed3   : > { %v2825_v58 = vpop.eup %2824 }
 0xed4   : > { %v2261_v59 = vadd.f32 1.0, %v2825_v58 }
 0xed6   : > { %v2262_v60 = vmul.f32 0.5, %v2261_v59 }
 0xed8   : > { %v2263_v16 = vmul.f32 %v2262_v60, %v2252_v35 }
 0xeda   : > { %v2264_v47 = vpack.c.bf16 %v2263_v16, %v2263_v16 }
 0xedc   : > { %2640 = vmatmul.msk.bf16.vlgmr.msrb.gmra.mxu3 %vm1364_vm13, %v2264_v47 }
 0xf5f   : > { %v2311_v62 = vpop.f32.mrf.mxu3 }
 0xf60   : > { %v2312_v17 = vadd.f32 %v2311_v62, %v2274_v61 }
 0xf62   : > { %v2315_v30 = vadd.f32 %v2312_v17, %v2219_v41 }
 0xf64   : > { %v2316_v63 = vsel %vm435_vm0, %v2315_v30, 0.0 }
 0xf65   : > { %2317 = vadd.xlane.f32.xlu1 %v2316_v63 }
 0xf67   : > { %v2313_v1 = vpop.f32.mrf.mxu3 }
 0xfd8   : > { %v2318_v2 = vpop.xlane.xlu1 %2317 }
 0xfd9   : > { %v2319_v4 = vmul.f32 %v2318_v2, %v3296_v8 }
 0xfdb   : > { %v2320_v5 = vsub.f32 %v2315_v30, %v2319_v4 }
 0xfdd   : > { %v2321_v21 = vmul.f32 %v2320_v5, %v2320_v5 }
 0xfdf   : > { %v2322_v7 = vsel %vm435_vm0, %v2321_v21, 0.0 }
 0xfe0   : > { %2323 = vadd.xlane.f32.xlu0 %v2322_v7 }
0x1053   : > { %v2324_v11 = vpop.xlane.xlu0 %2323 }
0x1054   : > { %v2325_v12 = vmul.f32 %v2324_v11, %v3296_v8 }
0x1056   : > { %v2326_v13 = vadd.f32 1e-12, %v2325_v12 }
0x1058   : > { %2826 = vrsqrt.f32 %v2326_v13  ;;  %vm2333_vm6 = vweird.f32 %v2326_v13 }
0x105e   : > { %v2827_v15 = vpop.eup %2826 }
0x105f   : > { %v2328_v6 = vmul.f32 %v2827_v15, %v2326_v13  ;;  %vm2334_vm5 = vweird.f32 %v2827_v15 }
0x1060   : > { %vm2335_vm7 = vmor %vm2333_vm6, %vm2334_vm5 }
0x1061   : > { %v2329_v18 = vmul.f32 %v2827_v15, %v2328_v6 }
0x1063   : > { %v2330_v19 = vmul.f32 0.5, %v2329_v18 }
0x1065   : > { %v2331_v20 = vsub.f32 1.5, %v2330_v19 }
0x1067   : > { %v2332_v22 = vmul.f32 %v2827_v15, %v2331_v20 }
0x1069   : > { %v2336_v24 = vsel %vm2335_vm7, %v2827_v15, %v2332_v22 }
0x106a   : > { %v2337_v25 = vmul.f32 %v2336_v24, %v2320_v5 }
0x106c   : > { %v2339_v8 = vmul.f32 %v2338_v23, %v2337_v25 }
0x106e   : > { %v2341_v26 = vadd.f32 %v2340_v46, %v2339_v8 }
0x1070   : > { %v2342_v0 = vpack.c.bf16 %v2341_v26, %v2341_v26 }
0x1072   : > { %2649 = vmatmul.msk.bf16.vlgmr.msra.gmra.mxu0 %vm435_vm0, %v2342_v0 }
0x10ef   : > { %v2372_v28 = vpop.f32.mrf.mxu0 }
0x10f0   : > { %v2373_v50 = vadd.f32 %v2372_v28, %v2347_v27 }
0x10f2   : > { %2828 = vtanh.f32 %v2373_v50 }
0x10f7   : > { %v2374_v29 = vpop.f32.mrf.mxu0 }
0x10f8   : > { %v2829_v3 = vpop.eup %2828 }
0x10f9   : > { %2377 = vst [vmem:[%s430_s13] sm:$0x1] %v2829_v3 }
0x10fa   : > { %3009 = shalt.err (!%p3006_p10)
}
0x10fb   : > { %2690 = dma.vmem_to_hbm [thread:$0]  (%p3216_p0), %s2390_s18, 16, %s2392_s14, %s2379_s20  }
0x10fc PF: > { %s3962_s22 = sld [smem:[#allocation18_spill]]  ;;  %s2403_s6 = sand.u32 1, %s3048_s30  }
0x10fd   : > { %s2404_s28 = scalar_lea.sflag [#allocation4], %s2403_s6 }
0x1102   : > { %p3963_p11 = scmp.ge.s32.totalorder %s3962_s22, 2 }
0x1104   : > { %p2710_p5 = pnand %p3963_p11, %p3224_p6 }
0x1106   : > { %p2711_p12 = pneg %p2710_p5 }
0x1108   : > { %3043 = dma.done.wait (%p2711_p12), %s2404_s28, 16  }
0x1109   : > { %3045 = vsyncadd (%p2711_p12), %s2404_s28, 4294967280  ;;  %s3964_s12 = sld [smem:[#allocation19_spill]]  ;;  %s3967_s30 = smov %s3052_s10 }
0x110a   : > { %s3965_s17 = sld [smem:[#allocation17_spill]] }
0x110b   : > { %s3966_s11 = sld [smem:[#allocation20_spill]] }
0x110f   : > { %p26_p2 = scmp.ge.s32.totalorder %s3964_s12, 4  }
0x1110   : > { %s3968_s10 = smov %s3965_s17 }
0x1111   :  { %28 = sbr.rel (!%p26_p2) target bundleno = 12 (0xc), region = 131 }
0x1116   :  { %2409 = vsyncpa [#allocation3], 1 }
0x1117   :  { %2411 = vsyncpa [#allocation3 + $0x1], 1 }
0x1118   :  { %2412 = vsyncpa [#allocation6], 1 }
0x1119   :  { %2414 = vsyncpa [#allocation6 + $0x1], 1 }
0x111a   :  { %2415 = vsyncpa [#allocation9], 1 }
0x111b   :  { %2416 = vsyncpa [#allocation4], 1 }
0x111c   :  { %2418 = vsyncpa [#allocation4 + $0x1], 1 }

</bundles_post_ra>
